<compile_context>
chip_gen: v7x
topology: tpu7x:2x2x1
jax: 0.10.0
libtpu: 0.0.40
codegen_flags: <defaults>
</compile_context>

<pallas_src>
from functools import partial

import jax
import jax.numpy as jnp
from jax import lax
from jax.experimental import pallas as pl
from jax.experimental.pallas import tpu as pltpu


# ----------------------------------------------------------------------------------
# Pallas kernel: one batch element per grid step.
# ----------------------------------------------------------------------------------
def attention_kernel(x_ref, wqkv_ref, woutt_ref, bout_ref, o_ref,
                     qkv_s, acc_s, *, heads, dim_head, scale, use_bf16_exp):
    # x_ref:     (C, HW)         f32, channel-major (pixels on the lane axis)
    # wqkv_ref:  (3*hidden, C)   bf16, rows ordered [q | k | v] (torch chunk(3, dim=1))
    # woutt_ref: (hidden, C)     bf16, output-projection weight, pre-transposed
    # bout_ref:  (C, 1)          f32
    # o_ref:     (C, HW)         f32
    # qkv_s:     (3*hidden, HW)  bf16 VMEM scratch (per-head tiles read via pl.ds)
    # acc_s:     (HW, C)         f32  VMEM scratch (output-projection accumulator)
    hidden = heads * dim_head

    # ---- fused qkv projection: one bf16 MXU matmul, f32 accumulate ----------------
    x_bf16 = x_ref[...].astype(jnp.bfloat16)
    qkv = jnp.dot(wqkv_ref[...], x_bf16,
                  preferred_element_type=jnp.float32)            # (3*hidden, HW) f32

    # Stash (pre-scaled q) | k | v as bf16; the head loop then only touches small
    # (dh, HW) tiles, bounding per-head live ranges (no vreg-file-sized unroll).
    qkv_s[0:hidden, :] = (qkv[0:hidden, :] * scale).astype(jnp.bfloat16)
    qkv_s[hidden:3 * hidden, :] = qkv[hidden:3 * hidden, :].astype(jnp.bfloat16)

    acc_s[...] = jnp.zeros_like(acc_s)

    def head_body(hd, carry):
        row = pl.multiple_of(hd * dim_head, dim_head)
        qh = qkv_s[pl.ds(row, dim_head), :]                      # (dh, HW) bf16 (scaled)
        kh = qkv_s[pl.ds(hidden + row, dim_head), :]             # (dh, HW) bf16
        vh = qkv_s[pl.ds(2 * hidden + row, dim_head), :]         # (dh, HW) bf16

        # sim[i, j] = sum_d q[d, i] * k[d, j]  -> (HW, HW) f32.  Only the small
        # (dh, HW) q operand is in transposed orientation; big tiles stay plain.
        sim = lax.dot_general(qh, kh, (((0,), (0,)), ((), ())),
                              preferred_element_type=jnp.float32)

        # Numerically stable softmax over j (the lane axis); max/sum/recip in f32.
        sim = sim - jnp.max(sim, axis=-1, keepdims=True)
        if use_bf16_exp:
            p = jnp.exp(sim.astype(jnp.bfloat16))                # bf16 EUP (v6e/v7x)
            denom = jnp.sum(p, axis=-1, keepdims=True, dtype=jnp.float32)
        else:
            p32 = jnp.exp(sim)                                   # f32 EUP (v5e)
            denom = jnp.sum(p32, axis=-1, keepdims=True)
            p = p32.astype(jnp.bfloat16)
        inv = pl.reciprocal(denom)                               # exact, f32, (HW, 1)

        # o_un[i, d] = sum_j p[i, j] * v[d, j]  -> (HW, dh) f32.  The big attention
        # tile is the plain (M, K) LHS; only the tiny (dh, HW) v gets transposed.
        o_un = lax.dot_general(p, vh, (((1,), (1,)), ((), ())),
                               preferred_element_type=jnp.float32)
        oh = o_un * inv                                          # normalize post-matmul

        # Accumulate this head's slice of the output 1x1 conv, transposed: (HW, C).
        w_h = woutt_ref[pl.ds(row, dim_head), :]                 # (dh, C) bf16
        acc_s[...] += jnp.dot(oh.astype(jnp.bfloat16), w_h,
                              preferred_element_type=jnp.float32)
        return carry

    lax.fori_loop(0, heads, head_body, 0)

    # One small (HW, C) -> (C, HW) transpose so the HBM store is lane-dense.
    out = jnp.transpose(acc_s[...]) + bout_ref[...]              # (C, HW) + (C, 1)
    o_ref[...] = out.astype(o_ref.dtype)


def _bf16_eup_supported():
    """bf16 exp on the EUP: yes on v6e/v7x, no on v5e and older."""
    try:
        kind = jax.devices()[0].device_kind.lower()
    except Exception:
        return False
    return not any(v in kind for v in ("v2", "v3", "v4", "v5"))


# ----------------------------------------------------------------------------------
# Wrapper: NCHW in / NCHW out.  Only reshapes activations at the boundary.
# ----------------------------------------------------------------------------------
def attention(x_nchw, params, *, heads, dim_head):
    N, C, H, W = x_nchw.shape
    hidden = heads * dim_head
    HW = H * W
    scale = float(dim_head) ** -0.5

    x = x_nchw.reshape(N, C, HW).astype(jnp.float32)             # channel-major

    # Weights are tiny + grid-resident: cast to bf16 once in the wrapper.  The
    # output-projection weight is pre-transposed to (hidden, C) so the in-kernel
    # per-head accumulation is a plain (M, K) @ (K, N) matmul.
    wqkv = params["qkv_w"].reshape(3 * hidden, C).astype(jnp.bfloat16)
    wout_t = jnp.transpose(params["out_w"].reshape(C, hidden)).astype(jnp.bfloat16)
    bout = params["out_b"].reshape(C, 1).astype(jnp.float32)

    kernel = partial(attention_kernel, heads=heads, dim_head=dim_head,
                     scale=scale, use_bf16_exp=_bf16_eup_supported())

    flops = N * (2 * HW * C * 3 * hidden                 # qkv projection
                 + heads * (2 * HW * HW * dim_head) * 2  # QK^T and attn@V
                 + 2 * HW * hidden * C)                  # output projection
    transcendentals = N * heads * HW * HW                # softmax exps
    bytes_accessed = (4 * 2 * N * C * HW                 # x in + out (f32)
                      + 2 * (wqkv.size + wout_t.size) + 4 * bout.size)

    out = pl.pallas_call(
        kernel,
        out_shape=jax.ShapeDtypeStruct((N, C, HW), jnp.float32),
        grid_spec=pltpu.PrefetchScalarGridSpec(
            num_scalar_prefetch=0,
            grid=(N,),
            in_specs=[
                pl.BlockSpec((None, C, HW), lambda b: (b, 0, 0)),   # x, one batch elem
                # TODO(synk): at production widths mark the three constant-index
                # weight inputs single-buffered (pipeline_mode=pl.Buffered(1)).
                pl.BlockSpec((3 * hidden, C), lambda b: (0, 0)),    # wqkv (resident)
                pl.BlockSpec((hidden, C), lambda b: (0, 0)),        # wout^T (resident)
                pl.BlockSpec((C, 1), lambda b: (0, 0)),             # bias (resident)
            ],
            out_specs=pl.BlockSpec((None, C, HW), lambda b: (b, 0, 0)),
            scratch_shapes=[
                pltpu.VMEM((3 * hidden, HW), jnp.bfloat16),          # qkv stash
                pltpu.VMEM((HW, C), jnp.float32),                    # out accumulator
            ],
        ),
        compiler_params=pltpu.CompilerParams(
            # Batch steps are independent -> shardable across v7x's 2 TensorCores.
            # TODO(synk): try pltpu.CORE_PARALLEL on v7x; add flash-style key tiling
            # (online softmax) before scaling past 32x32 feature maps, since the
            # per-head sim tile is HW^2 * 4 B and v7x has only 64 MiB VMEM.
            dimension_semantics=("parallel",),
            vmem_limit_bytes=32 * 1024 * 1024,
        ),
        cost_estimate=pl.CostEstimate(
            flops=flops, transcendentals=transcendentals,
            bytes_accessed=bytes_accessed),
    )(x, wqkv, wout_t, bout)

    return out.reshape(N, C, H, W)


# ----------------------------------------------------------------------------------
# Pure-JAX reference (mirrors the PyTorch module) for a correctness check.
# ----------------------------------------------------------------------------------
def reference(x, params, heads, dim_head):
    N, C, H, W = x.shape
    hidden = heads * dim_head
    HW = H * W
    scale = float(dim_head) ** -0.5
    P = lax.Precision.HIGHEST

    wqkv = params["qkv_w"].reshape(3 * hidden, C)
    qkv = jnp.einsum("oc,bchw->bohw", wqkv, x, precision=P)              # (N, 3h, H, W)
    q, k, v = jnp.split(qkv, 3, axis=1)
    to_heads = lambda t: t.reshape(N, heads, dim_head, HW)
    q, k, v = map(to_heads, (q, k, v))
    q = q * scale
    sim = jnp.einsum("bhdi,bhdj->bhij", q, k, precision=P)
    sim = sim - jnp.max(sim, axis=-1, keepdims=True)
    attn = jax.nn.softmax(sim, axis=-1)
    out = jnp.einsum("bhij,bhdj->bhid", attn, v, precision=P)            # (N, h, HW, dh)
    out = jnp.transpose(out, (0, 1, 3, 2)).reshape(N, hidden, H, W)      # b (h d) x y
    wout = params["out_w"].reshape(C, hidden)
    y = jnp.einsum("oc,bchw->bohw", wout, out, precision=P)
    return y + params["out_b"].reshape(1, C, 1, 1)


if __name__ == "__main__":
    N, dim, heads, dim_head, H, W = 2, 32, 4, 16, 16, 16
    hidden = heads * dim_head

    key = jax.random.PRNGKey(0)
    k1, k2, k3, k4 = jax.random.split(key, 4)
    params = {
        "qkv_w": 0.1 * jax.random.normal(k1, (3 * hidden, dim, 1, 1), jnp.float32),
        "out_w": 0.1 * jax.random.normal(k2, (dim, hidden, 1, 1), jnp.float32),
        "out_b": 0.1 * jax.random.normal(k3, (dim,), jnp.float32),
    }
    x = jax.random.normal(k4, (N, dim, H, W), jnp.float32)

    out = attention(x, params, heads=heads, dim_head=dim_head)
    out = jax.block_until_ready(out)

    ref = reference(x, params, heads, dim_head)
    assert out.shape == (N, dim, H, W)
    abs_err = float(jnp.max(jnp.abs(out - ref)))
    rel_err = float(jnp.linalg.norm(out - ref) / jnp.linalg.norm(ref))
    # bf16 MXU operands (+ bf16 exp on v6e/v7x) vs the f32 HIGHEST-precision reference.
    assert abs_err < 2.5e-2 and rel_err < 1e-2, f"abs {abs_err} rel {rel_err}"

    print("KERNEL_OK")
</pallas_src>

<mosaic_0001>
module attributes {stable_mosaic.version = 11 : i64} {
  func.func @attention_kernel(%arg0: i32, %arg1: memref<1x32x256xf32, #tpu.memory_space<vmem>>, %arg2: memref<192x32xbf16, #tpu.memory_space<vmem>>, %arg3: memref<64x32xbf16, #tpu.memory_space<vmem>>, %arg4: memref<32x1xf32, #tpu.memory_space<vmem>>, %arg5: memref<1x32x256xf32, #tpu.memory_space<vmem>>, %arg6: memref<192x256xbf16, #tpu.memory_space<vmem>>, %arg7: memref<256x32xf32, #tpu.memory_space<vmem>>) attributes {dimension_semantics = [#tpu.dimension_semantics<parallel>], iteration_bounds = array<i64: 2>, scalar_prefetch = 0 : i64, scratch_operands = 2 : i64, tpu.core_type = #tpu.core_type<tc>, window_params = [{transform_indices = @transform_0, window_bounds = array<i64: 1, 32, 256>}, {pipeline_mode = #tpu.pipeline_mode<synchronous>, transform_indices = @transform_1, window_bounds = array<i64: 192, 32>}, {pipeline_mode = #tpu.pipeline_mode<synchronous>, transform_indices = @transform_2, window_bounds = array<i64: 64, 32>}, {pipeline_mode = #tpu.pipeline_mode<synchronous>, transform_indices = @transform_3, window_bounds = array<i64: 32, 1>}, {transform_indices = @transform_4, window_bounds = array<i64: 1, 32, 256>}]} {
    %c0 = arith.constant 0 : index
    %c0_0 = arith.constant 0 : index
    %c0_1 = arith.constant 0 : index
    %0 = vector.load %arg1[%c0, %c0_0, %c0_1] : memref<1x32x256xf32, #tpu.memory_space<vmem>>, vector<1x32x256xf32>
    %1 = vector.shape_cast %0 : vector<1x32x256xf32> to vector<32x256xf32>
    %2 = arith.truncf %1 : vector<32x256xf32> to vector<32x256xbf16>
    %c0_2 = arith.constant 0 : index
    %c0_3 = arith.constant 0 : index
    %3 = vector.load %arg2[%c0_2, %c0_3] : memref<192x32xbf16, #tpu.memory_space<vmem>>, vector<192x32xbf16>
    %cst = arith.constant dense<0.000000e+00> : vector<192x256xf32>
    %4 = tpu.matmul %3, %2, %cst {dimension_numbers = #tpu.dot_dimension_numbers<[1], [0], [0], [1], [0, 0, 1, 1], [], []>} : vector<192x32xbf16>, vector<32x256xbf16>, vector<192x256xf32> -> vector<192x256xf32>
    %5 = vector.extract_strided_slice %4 {offsets = [0, 0], sizes = [64, 256], strides = [1, 1]} : vector<192x256xf32> to vector<64x256xf32>
    %cst_4 = arith.constant 2.500000e-01 : f32
    %6 = vector.broadcast %cst_4 : f32 to vector<64x256xf32>
    %7 = arith.mulf %5, %6 : vector<64x256xf32>
    %8 = arith.truncf %7 : vector<64x256xf32> to vector<64x256xbf16>
    %c0_5 = arith.constant 0 : index
    %c0_6 = arith.constant 0 : index
    %9 = vector.load %arg6[%c0_5, %c0_6] : memref<192x256xbf16, #tpu.memory_space<vmem>>, vector<64x256xbf16>
    tpu.vector_store %arg6[%c0_5, %c0_6], %8 {strides = array<i32>} : memref<192x256xbf16, #tpu.memory_space<vmem>>, vector<64x256xbf16>,
    %10 = vector.extract_strided_slice %4 {offsets = [64, 0], sizes = [128, 256], strides = [1, 1]} : vector<192x256xf32> to vector<128x256xf32>
    %11 = arith.truncf %10 : vector<128x256xf32> to vector<128x256xbf16>
    %c64 = arith.constant 64 : index
    %c0_7 = arith.constant 0 : index
    %12 = vector.load %arg6[%c64, %c0_7] : memref<192x256xbf16, #tpu.memory_space<vmem>>, vector<128x256xbf16>
    tpu.vector_store %arg6[%c64, %c0_7], %11 {strides = array<i32>} : memref<192x256xbf16, #tpu.memory_space<vmem>>, vector<128x256xbf16>,
    %cst_8 = arith.constant 0.000000e+00 : f32
    %13 = vector.broadcast %cst_8 : f32 to vector<256x32xf32>
    %c0_9 = arith.constant 0 : index
    %c0_10 = arith.constant 0 : index
    %14 = vector.load %arg7[%c0_9, %c0_10] : memref<256x32xf32, #tpu.memory_space<vmem>>, vector<256x32xf32>
    tpu.vector_store %arg7[%c0_9, %c0_10], %13 {strides = array<i32>} : memref<256x32xf32, #tpu.memory_space<vmem>>, vector<256x32xf32>,
    %c0_i32 = arith.constant 0 : i32
    %c4_i32 = arith.constant 4 : i32
    %15 = arith.addi %c0_i32, %c4_i32 : i32
    %c1_i32 = arith.constant 1 : i32
    scf.for %arg8 = %c0_i32 to %15 step %c1_i32  : i32 {
      %c16_i32 = arith.constant 16 : i32
      %24 = arith.muli %arg8, %c16_i32 : i32
      %25 = tpu.assume_multiple %24, 16 : i32
      %26 = arith.index_cast %25 : i32 to index
      %c0_19 = arith.constant 0 : index
      %27 = vector.load %arg6[%26, %c0_19] : memref<192x256xbf16, #tpu.memory_space<vmem>>, vector<16x256xbf16>
      %c64_i32 = arith.constant 64 : i32
      %28 = arith.addi %c64_i32, %25 : i32
      %29 = arith.index_cast %28 : i32 to index
      %c0_20 = arith.constant 0 : index
      %30 = vector.load %arg6[%29, %c0_20] : memref<192x256xbf16, #tpu.memory_space<vmem>>, vector<16x256xbf16>
      %c128_i32 = arith.constant 128 : i32
      %31 = arith.addi %c128_i32, %25 : i32
      %32 = arith.index_cast %31 : i32 to index
      %c0_21 = arith.constant 0 : index
      %33 = vector.load %arg6[%32, %c0_21] : memref<192x256xbf16, #tpu.memory_space<vmem>>, vector<16x256xbf16>
      %cst_22 = arith.constant dense<0.000000e+00> : vector<256x256xf32>
      %34 = tpu.matmul %27, %30, %cst_22 {dimension_numbers = #tpu.dot_dimension_numbers<[0], [0], [1], [1], [0, 1, 1, 1], [], []>} : vector<16x256xbf16>, vector<16x256xbf16>, vector<256x256xf32> -> vector<256x256xf32>
      %cst_23 = arith.constant dense<0xFF800000> : vector<256xf32>
      %35 = vector.multi_reduction <maximumf>, %34, %cst_23 [1] : vector<256x256xf32> to vector<256xf32>
      %36 = vector.shape_cast %35 : vector<256xf32> to vector<256x1xf32>
      %37 = vector.broadcast %36 : vector<256x1xf32> to vector<256x256xf32>
      %38 = arith.subf %34, %37 : vector<256x256xf32>
      %39 = arith.truncf %38 : vector<256x256xf32> to vector<256x256xbf16>
      %40 = math.exp %39 : vector<256x256xbf16>
      %41 = arith.extf %40 : vector<256x256xbf16> to vector<256x256xf32>
      %cst_24 = arith.constant dense<0.000000e+00> : vector<256xf32>
      %42 = vector.multi_reduction <add>, %41, %cst_24 [1] : vector<256x256xf32> to vector<256xf32>
      %43 = vector.shape_cast %42 : vector<256xf32> to vector<256x1xf32>
      %44 = tpu.reciprocal %43 : vector<256x1xf32> -> vector<256x1xf32>
      %cst_25 = arith.constant dense<0.000000e+00> : vector<256x16xf32>
      %45 = tpu.matmul %40, %33, %cst_25 {dimension_numbers = #tpu.dot_dimension_numbers<[1], [1], [0], [0], [0, 0, 1, 0], [], []>} : vector<256x256xbf16>, vector<16x256xbf16>, vector<256x16xf32> -> vector<256x16xf32>
      %46 = vector.broadcast %44 : vector<256x1xf32> to vector<256x16xf32>
      %47 = arith.mulf %45, %46 : vector<256x16xf32>
      %48 = arith.index_cast %25 : i32 to index
      %c0_26 = arith.constant 0 : index
      %49 = vector.load %arg3[%48, %c0_26] : memref<64x32xbf16, #tpu.memory_space<vmem>>, vector<16x32xbf16>
      %c0_27 = arith.constant 0 : index
      %c0_28 = arith.constant 0 : index
      %50 = vector.load %arg7[%c0_27, %c0_28] : memref<256x32xf32, #tpu.memory_space<vmem>>, vector<256x32xf32>
      %51 = arith.truncf %47 : vector<256x16xf32> to vector<256x16xbf16>
      %cst_29 = arith.constant dense<0.000000e+00> : vector<256x32xf32>
      %52 = tpu.matmul %51, %49, %cst_29 {dimension_numbers = #tpu.dot_dimension_numbers<[1], [0], [0], [1], [0, 0, 1, 1], [], []>} : vector<256x16xbf16>, vector<16x32xbf16>, vector<256x32xf32> -> vector<256x32xf32>
      %53 = arith.addf %50, %52 : vector<256x32xf32>
      %c0_30 = arith.constant 0 : index
      %c0_31 = arith.constant 0 : index
      %54 = vector.load %arg7[%c0_30, %c0_31] : memref<256x32xf32, #tpu.memory_space<vmem>>, vector<256x32xf32>
      tpu.vector_store %arg7[%c0_30, %c0_31], %53 {strides = array<i32>} : memref<256x32xf32, #tpu.memory_space<vmem>>, vector<256x32xf32>,
    }
    %c4_i32_11 = arith.constant 4 : i32
    %c0_12 = arith.constant 0 : index
    %c0_13 = arith.constant 0 : index
    %16 = vector.load %arg7[%c0_12, %c0_13] : memref<256x32xf32, #tpu.memory_space<vmem>>, vector<256x32xf32>
    %17 = tpu.transpose %16, [1, 0] : vector<256x32xf32> -> vector<32x256xf32>
    %c0_14 = arith.constant 0 : index
    %c0_15 = arith.constant 0 : index
    %18 = vector.load %arg4[%c0_14, %c0_15] : memref<32x1xf32, #tpu.memory_space<vmem>>, vector<32x1xf32>
    %19 = vector.broadcast %18 : vector<32x1xf32> to vector<32x256xf32>
    %20 = arith.addf %17, %19 : vector<32x256xf32>
    %c0_16 = arith.constant 0 : index
    %c0_17 = arith.constant 0 : index
    %c0_18 = arith.constant 0 : index
    %21 = vector.load %arg5[%c0_16, %c0_17, %c0_18] : memref<1x32x256xf32, #tpu.memory_space<vmem>>, vector<1x32x256xf32>
    %22 = vector.shape_cast %21 : vector<1x32x256xf32> to vector<32x256xf32>
    %23 = vector.shape_cast %20 : vector<32x256xf32> to vector<1x32x256xf32>
    tpu.vector_store %arg5[%c0_16, %c0_17, %c0_18], %23 {strides = array<i32>} : memref<1x32x256xf32, #tpu.memory_space<vmem>>, vector<1x32x256xf32>,
    return
  }
  func.func @transform_0(%arg0: i32) -> (i32, i32, i32) {
    %c0_i32 = arith.constant 0 : i32
    %c0_i32_0 = arith.constant 0 : i32
    %c0_i32_1 = arith.constant 0 : i32
    return %arg0, %c0_i32, %c0_i32_0 : i32, i32, i32
  }
  func.func @transform_1(%arg0: i32) -> (i32, i32) {
    %c0_i32 = arith.constant 0 : i32
    %c0_i32_0 = arith.constant 0 : i32
    %c0_i32_1 = arith.constant 0 : i32
    return %c0_i32, %c0_i32_0 : i32, i32
  }
  func.func @transform_2(%arg0: i32) -> (i32, i32) {
    %c0_i32 = arith.constant 0 : i32
    %c0_i32_0 = arith.constant 0 : i32
    %c0_i32_1 = arith.constant 0 : i32
    return %c0_i32, %c0_i32_0 : i32, i32
  }
  func.func @transform_3(%arg0: i32) -> (i32, i32) {
    %c0_i32 = arith.constant 0 : i32
    %c0_i32_0 = arith.constant 0 : i32
    %c0_i32_1 = arith.constant 0 : i32
    return %c0_i32, %c0_i32_0 : i32, i32
  }
  func.func @transform_4(%arg0: i32) -> (i32, i32, i32) {
    %c0_i32 = arith.constant 0 : i32
    %c0_i32_0 = arith.constant 0 : i32
    %c0_i32_1 = arith.constant 0 : i32
    return %arg0, %c0_i32, %c0_i32_0 : i32, i32, i32
  }
}

</mosaic_0001>

<bundles_post_ra>
// kernel: tpu_custom_call.1
= control target key start
LH: loop header
LB: loop body
LE: loop exit
PB: predicated region body
PF: predicated region fallthrough
CT: control target
= control target key end

     0   :  { %9 = vsyncpa [#allocation5], 0  ;;  %s3137_s0 = inlined_call_operand.vmem [shape: f32[2,32,256], index: 0, kind: input, shape index: {}]   ;;  %s3138_s1 = inlined_call_operand.vmem [shape: bf16[192,32], index: 1, kind: input, shape index: {}]   ;;  %s3139_s2 = inlined_call_operand.vmem [shape: bf16[64,32], index: 2, kind: input, shape index: {}]   ;;  %s3140_s3 = inlined_call_operand.vmem [shape: f32[32,1], index: 3, kind: input, shape index: {}]   ;;  %s3141_s4 = inlined_call_operand.hbm [shape: f32[2,32,256], index: 4, kind: output, shape index: {}]  }
   0x1   :  { %11 = vsyncpa [#allocation5 + $0x1], 0  ;;  %s2551_s15 = smov 0   ;;  %s2553_s16 = smov 0  }
   0x2   :  { %s2555_s17 = smov 0   ;;  %s2557_s18 = smov 0  }
   0x3 LB: > { %s2572_s19 = sadd.s32 4294967295, %s2514_s18   ;;  %s2114_s20 = sadd.s32 4294967294, %s2514_s18   ;;  %s2514_s18 = sphi %s2557_s18, %s3199_s18   ;;  %s2510_s17 = sphi %s2555_s17, %s3198_s17   ;;  %s2506_s16 = sphi %s2553_s16, %s3197_s16   ;;  %s2502_s15 = sphi %s2551_s15, %s3196_s15  }
   0x4   : > { %s2576_s21 = sadd.s32 1, %s2514_s18   ;;  %s113_s22 = sadd.s32 1, %s2510_s17 }
   0x5   : > { %s110_s23 = ssub.s32 %s2514_s18, %s2576_s21  ;;  %p123_p0 = scmp.ne.s32.totalorder %s2510_s17, %s2506_s16 }
   0x6   : > { %p111_p1 = scmp.eq.s32.totalorder %s110_s23, 0  ;;  %p124_p2 = scmp.eq.s32.totalorder %s2572_s19, 1 }
   0x7   : > { %p129_p3 = scmp.ne.s32.totalorder %s2506_s16, %s2502_s15  ;;  %p130_p4 = scmp.eq.s32.totalorder %s2114_s20, 1 }
   0x8   : > { %s2587_s24 = scalar_select %p111_p1, %s2510_s17, %s113_s22  }
   0x9   : > { %p2589_p5 = por %p124_p2, %p123_p0  ;;  %p2593_p6 = por %p130_p4, %p129_p3 }
   0xa   : > { %p2117_p7 = scmp.ge.s32.totalorder %s2514_s18, 1  ;;  %p165_p8 = scmp.lt.s32.totalorder %s2514_s18, 3 }
   0xc   : > { %p166_p9 = pnand %p2117_p7, %p165_p8 }
   0xd   : > { %s188_s27 = sand.u32 (!%p166_p9), 1, %s2506_s16   ;;  %p191_p10 = scmp.lt.s32.totalorder (!%p166_p9), %s2572_s19, 1  ;;  %v3142_v0 = vmov (!%p166_p9), 0   ;;  %vm293_vm0 = vcmask (!%p166_p9), 261120   ;;  %v2521_v1 = vmov (!%p166_p9), 0.0   ;;  %v2305_v14 = vld [vmem:[%s3138_s1] sm:$0xff] (!%p166_p9)  }
   0xe   : > { %169 = sbr.rel (%p166_p9) target bundleno = 1476 (0x5c4), region = 36  ;;  %s2603_s28 = sshll.u32 (!%p166_p9), %s188_s27, 6  ;;  %362 = vmatprep.mubr.bf16.mxu0 (!%p166_p9), %v3142_v0  ;;  %422 = vmatprep.mubr.bf16.mxu1 (!%p166_p9), %v3142_v0  ;;  %547 = vst.msk [vmem:[#allocation3] sm:$0xff] (!%p166_p9), %vm293_vm0, %v2521_v1  ;;  %548 = vst.msk [vmem:[#allocation3 + $0x8] sm:$0xff] (!%p166_p9), %vm293_vm0, %v2521_v1  ;;  %v2306_v15 = vld [vmem:[%s3138_s1 + $0x30] sm:$0xff] (!%p166_p9)   ;;  %v2307_v16 = vld [vmem:[%s3138_s1 + $0x8] sm:$0xff] (!%p166_p9)  }
   0xf   : > { %549 = vst.msk [vmem:[#allocation3 + $0x10] sm:$0xff] (!%p166_p9), %vm293_vm0, %v2521_v1  ;;  %550 = vst.msk [vmem:[#allocation3 + $0x18] sm:$0xff] (!%p166_p9), %vm293_vm0, %v2521_v1  ;;  %v2308_v17 = vld [vmem:[%s3138_s1 + $0x38] sm:$0xff] (!%p166_p9)   ;;  %v2309_v18 = vld [vmem:[%s3138_s1 + $0x10] sm:$0xff] (!%p166_p9)   ;;  %s2704_s23 = scalar_lea.vmem (!%p166_p9), [#allocation4], %s2603_s28 }
  0x10   : > { %551 = vst.msk [vmem:[#allocation3 + $0x20] sm:$0xff] (!%p166_p9), %vm293_vm0, %v2521_v1  ;;  %552 = vst.msk [vmem:[#allocation3 + $0x28] sm:$0xff] (!%p166_p9), %vm293_vm0, %v2521_v1  ;;  %v2310_v19 = vld [vmem:[%s3138_s1 + $0x40] sm:$0xff] (!%p166_p9)   ;;  %v2311_v20 = vld [vmem:[%s3138_s1 + $0x18] sm:$0xff] (!%p166_p9)  }
  0x11   : > { %553 = vst.msk [vmem:[#allocation3 + $0x30] sm:$0xff] (!%p166_p9), %vm293_vm0, %v2521_v1  ;;  %554 = vst.msk [vmem:[#allocation3 + $0x38] sm:$0xff] (!%p166_p9), %vm293_vm0, %v2521_v1  ;;  %v2312_v21 = vld [vmem:[%s3138_s1 + $0x48] sm:$0xff] (!%p166_p9)   ;;  %v2313_v22 = vld [vmem:[%s3138_s1 + $0x20] sm:$0xff] (!%p166_p9)  }
  0x12   : > { %555 = vst.msk [vmem:[#allocation3 + $0x40] sm:$0xff] (!%p166_p9), %vm293_vm0, %v2521_v1  ;;  %556 = vst.msk [vmem:[#allocation3 + $0x48] sm:$0xff] (!%p166_p9), %vm293_vm0, %v2521_v1  ;;  %v2314_v23 = vld [vmem:[%s3138_s1 + $0x50] sm:$0xff] (!%p166_p9)   ;;  %v2315_v24 = vld [vmem:[%s3138_s1 + $0x28] sm:$0xff] (!%p166_p9)  }
  0x13   : > { %557 = vst.msk [vmem:[#allocation3 + $0x50] sm:$0xff] (!%p166_p9), %vm293_vm0, %v2521_v1  ;;  %558 = vst.msk [vmem:[#allocation3 + $0x58] sm:$0xff] (!%p166_p9), %vm293_vm0, %v2521_v1  ;;  %v2316_v25 = vld [vmem:[%s3138_s1 + $0x58] sm:$0xff] (!%p166_p9)  }
  0x14   : > { %559 = vst.msk [vmem:[#allocation3 + $0x60] sm:$0xff] (!%p166_p9), %vm293_vm0, %v2521_v1  ;;  %560 = vst.msk [vmem:[#allocation3 + $0x68] sm:$0xff] (!%p166_p9), %vm293_vm0, %v2521_v1 }
  0x15   : > { %561 = vst.msk [vmem:[#allocation3 + $0x70] sm:$0xff] %vm293_vm0, %v2521_v1  ;;  %562 = vst.msk [vmem:[#allocation3 + $0x78] sm:$0xff] %vm293_vm0, %v2521_v1  ;;  %s192_s29 = scalar_select %p191_p10, %s2572_s19, 1 }
  0x16   : > { %563 = vst.msk [vmem:[#allocation3 + $0x80] sm:$0xff] %vm293_vm0, %v2521_v1  ;;  %564 = vst.msk [vmem:[#allocation3 + $0x88] sm:$0xff] %vm293_vm0, %v2521_v1 }
  0x17   : > { %565 = vst.msk [vmem:[#allocation3 + $0x90] sm:$0xff] %vm293_vm0, %v2521_v1  ;;  %566 = vst.msk [vmem:[#allocation3 + $0x98] sm:$0xff] %vm293_vm0, %v2521_v1  ;;  %s2191_s30 = sshll.u32 %s192_s29, 6  ;;  %s2706_s29 = smov 0  }
  0x18   : > { %567 = vst.msk [vmem:[#allocation3 + $0xa0] sm:$0xff] %vm293_vm0, %v2521_v1  ;;  %568 = vst.msk [vmem:[#allocation3 + $0xa8] sm:$0xff] %vm293_vm0, %v2521_v1  ;;  %s195_s7 = scalar_lea.vmem %s3137_s0, %s2191_s30 }
  0x19   : > { %569 = vst.msk [vmem:[#allocation3 + $0xb0] sm:$0xff] %vm293_vm0, %v2521_v1  ;;  %570 = vst.msk [vmem:[#allocation3 + $0xb8] sm:$0xff] %vm293_vm0, %v2521_v1  ;;  %v198_v2 = vld [vmem:[%s195_s7 + $0x8] sm:$0xff]  ;;  %v200_v3 = vld [vmem:[%s195_s7 + $0x18] sm:$0xff] }
  0x1a   : > { %571 = vst.msk [vmem:[#allocation3 + $0xc0] sm:$0xff] %vm293_vm0, %v2521_v1  ;;  %572 = vst.msk [vmem:[#allocation3 + $0xc8] sm:$0xff] %vm293_vm0, %v2521_v1  ;;  %v197_v4 = vld [vmem:[%s195_s7] sm:$0xff]  ;;  %v206_v5 = vpack.c.bf16 %v200_v3, %v198_v2  ;;  %v199_v6 = vld [vmem:[%s195_s7 + $0x10] sm:$0xff] }
  0x1b   : > { %573 = vst.msk [vmem:[#allocation3 + $0xd0] sm:$0xff] %vm293_vm0, %v2521_v1  ;;  %574 = vst.msk [vmem:[#allocation3 + $0xd8] sm:$0xff] %vm293_vm0, %v2521_v1  ;;  %v202_v7 = vld [vmem:[%s195_s7 + $0x28] sm:$0xff]  ;;  %v204_v8 = vld [vmem:[%s195_s7 + $0x38] sm:$0xff]  ;;  %v205_v9 = vpack.c.bf16 %v199_v6, %v197_v4 }
  0x1c   : > { %575 = vst.msk [vmem:[#allocation3 + $0xe0] sm:$0xff] %vm293_vm0, %v2521_v1  ;;  %576 = vst.msk [vmem:[#allocation3 + $0xe8] sm:$0xff] %vm293_vm0, %v2521_v1  ;;  %v208_v10 = vpack.c.bf16 %v204_v8, %v202_v7  ;;  %v201_v11 = vld [vmem:[%s195_s7 + $0x20] sm:$0xff]  ;;  %v203_v12 = vld [vmem:[%s195_s7 + $0x30] sm:$0xff]  ;;  %330 = vmatprep.subr.bf16.mxu0 %v206_v5  ;;  %2247 = vmatprep.subr.bf16.mxu1 %v206_v5 }
  0x1d   : > { %577 = vst.msk [vmem:[#allocation3 + $0xf0] sm:$0xff] %vm293_vm0, %v2521_v1  ;;  %578 = vst.msk [vmem:[#allocation3 + $0xf8] sm:$0xff] %vm293_vm0, %v2521_v1  ;;  %331 = vmatpush1.bf16.msra.mxu0 %v205_v9  ;;  %2249 = vmatpush1.bf16.msra.mxu1 %v205_v9  ;;  %v207_v13 = vpack.c.bf16 %v203_v12, %v201_v11 }
  0x1e   : > { %332 = vmatprep.subr.bf16.mxu0 %v208_v10  ;;  %2248 = vmatprep.subr.bf16.mxu1 %v208_v10 }
  0x21   : > { %333 = vmatpush1.bf16.msra.mxu0 %v207_v13  ;;  %2250 = vmatpush1.bf16.msra.mxu1 %v207_v13 }
  0x24   : > { %2133 = vmatmul.mubr.msk.bf16.vlgmr.msra.gmra.mrb[0].mxu0 %vm293_vm0, %v2305_v14  ;;  %2139 = vmatmul.mubr.msk.bf16.vlgmr.msra.gmra.mrb[0].mxu1 %vm293_vm0, %v2306_v15 }
  0x25   : > { %372 = vmatprep.mubr.bf16.mxu0 %v3142_v0  ;;  %432 = vmatprep.mubr.bf16.mxu1 %v3142_v0 }
  0x2c   : > { %2134 = vmatmul.mubr.msk.bf16.gmra.mrb[4].mxu0 %vm293_vm0, %v2307_v16  ;;  %2140 = vmatmul.mubr.msk.bf16.gmra.mrb[4].mxu1 %vm293_vm0, %v2308_v17 }
  0x2d   : > { %382 = vmatprep.mubr.bf16.mxu0 %v3142_v0  ;;  %442 = vmatprep.mubr.bf16.mxu1 %v3142_v0 }
  0x34   : > { %2135 = vmatmul.mubr.msk.bf16.gmra.mrb[8].mxu0 %vm293_vm0, %v2309_v18  ;;  %2141 = vmatmul.mubr.msk.bf16.gmra.mrb[8].mxu1 %vm293_vm0, %v2310_v19 }
  0x35   : > { %392 = vmatprep.mubr.bf16.mxu0 %v3142_v0  ;;  %452 = vmatprep.mubr.bf16.mxu1 %v3142_v0 }
  0x3c   : > { %2136 = vmatmul.mubr.msk.bf16.gmra.mrb[12].mxu0 %vm293_vm0, %v2311_v20  ;;  %2142 = vmatmul.mubr.msk.bf16.gmra.mrb[12].mxu1 %vm293_vm0, %v2312_v21 }
  0x3d   : > { %402 = vmatprep.mubr.bf16.mxu0 %v3142_v0  ;;  %462 = vmatprep.mubr.bf16.mxu1 %v3142_v0 }
  0x44   : > { %2137 = vmatmul.mubr.msk.bf16.gmra.mrb[16].mxu0 %vm293_vm0, %v2313_v22  ;;  %2143 = vmatmul.mubr.msk.bf16.gmra.mrb[16].mxu1 %vm293_vm0, %v2314_v23 }
  0x45   : > { %412 = vmatprep.mubr.bf16.mxu0 %v3142_v0  ;;  %472 = vmatprep.mubr.bf16.mxu1 %v3142_v0 }
  0x4c   : > { %2138 = vmatmul.mubr.msk.bf16.gmra.mrb[20].mxu0 %vm293_vm0, %v2315_v24  ;;  %2144 = vmatmul.mubr.msk.bf16.gmra.mrb[20].mxu1 %vm293_vm0, %v2316_v25 }
  0xf7   : > { %v364_v26 = vpop.f32.mrb[0].mxu0  ;;  %v424_v27 = vpop.f32.mrb[0].mxu1 }
  0xf8   : > { %v366_v28 = vpop.f32.mrb[1].mxu0  ;;  %v426_v29 = vpop.f32.mrb[1].mxu1  ;;  %v483_v32 = vmul.f32 0.25, %v364_v26 }
  0xf9   : > { %v368_v30 = vpop.f32.mrb[2].mxu0  ;;  %v428_v31 = vpop.f32.mrb[2].mxu1  ;;  %v484_v37 = vmul.f32 0.25, %v366_v28 }
  0xfa   : > { %v485_v33 = vmul.f32 0.25, %v368_v30  ;;  %v519_v34 = vpack.c.bf16 %v428_v31, %v424_v27  ;;  %v370_v35 = vpop.f32.mrb[3].mxu0  ;;  %v430_v36 = vpop.f32.mrb[3].mxu1 }
  0xfb   : > { %v486_v38 = vmul.f32 0.25, %v370_v35  ;;  %v520_v39 = vpack.c.bf16 %v430_v36, %v426_v29 }
  0xfc   : > { %v499_v40 = vpack.c.bf16 %v485_v33, %v483_v32  ;;  %535 = vst [vmem:[#allocation2 + $0x60] sm:$0xff] %v519_v34 }
  0xfd   : > { %v500_v41 = vpack.c.bf16 %v486_v38, %v484_v37  ;;  %536 = vst [vmem:[#allocation2 + $0x68] sm:$0xff] %v520_v39 }
  0xfe   : > { %507 = vst [vmem:[#allocation2] sm:$0xff] %v499_v40 }
  0xff   : > { %508 = vst [vmem:[#allocation2 + $0x8] sm:$0xff] %v500_v41  ;;  %v374_v42 = vpop.f32.mrb[4].mxu0  ;;  %v434_v43 = vpop.f32.mrb[4].mxu1 }
 0x100   : > { %v376_v44 = vpop.f32.mrb[5].mxu0  ;;  %v436_v45 = vpop.f32.mrb[5].mxu1  ;;  %v487_v48 = vmul.f32 0.25, %v374_v42 }
 0x101   : > { %v378_v46 = vpop.f32.mrb[6].mxu0  ;;  %v438_v47 = vpop.f32.mrb[6].mxu1  ;;  %v488_v53 = vmul.f32 0.25, %v376_v44 }
 0x102   : > { %v489_v49 = vmul.f32 0.25, %v378_v46  ;;  %v521_v50 = vpack.c.bf16 %v438_v47, %v434_v43  ;;  %v380_v51 = vpop.f32.mrb[7].mxu0  ;;  %v440_v52 = vpop.f32.mrb[7].mxu1 }
 0x103   : > { %v490_v54 = vmul.f32 0.25, %v380_v51  ;;  %v522_v55 = vpack.c.bf16 %v440_v52, %v436_v45 }
 0x104   : > { %v501_v56 = vpack.c.bf16 %v489_v49, %v487_v48  ;;  %537 = vst [vmem:[#allocation2 + $0x70] sm:$0xff] %v521_v50 }
 0x105   : > { %v502_v57 = vpack.c.bf16 %v490_v54, %v488_v53  ;;  %538 = vst [vmem:[#allocation2 + $0x78] sm:$0xff] %v522_v55 }
 0x106   : > { %509 = vst [vmem:[#allocation2 + $0x10] sm:$0xff] %v501_v56 }
 0x107   : > { %510 = vst [vmem:[#allocation2 + $0x18] sm:$0xff] %v502_v57  ;;  %v384_v58 = vpop.f32.mrb[8].mxu0  ;;  %v444_v59 = vpop.f32.mrb[8].mxu1 }
 0x108   : > { %v386_v60 = vpop.f32.mrb[9].mxu0  ;;  %v446_v61 = vpop.f32.mrb[9].mxu1  ;;  %v491_v1 = vmul.f32 0.25, %v384_v58 }
 0x109   : > { %v388_v62 = vpop.f32.mrb[10].mxu0  ;;  %v448_v63 = vpop.f32.mrb[10].mxu1  ;;  %v492_v6 = vmul.f32 0.25, %v386_v60 }
 0x10a   : > { %v493_v2 = vmul.f32 0.25, %v388_v62  ;;  %v523_v3 = vpack.c.bf16 %v448_v63, %v444_v59  ;;  %v390_v4 = vpop.f32.mrb[11].mxu0  ;;  %v450_v5 = vpop.f32.mrb[11].mxu1 }
 0x10b   : > { %v494_v7 = vmul.f32 0.25, %v390_v4  ;;  %v524_v8 = vpack.c.bf16 %v450_v5, %v446_v61 }
 0x10c   : > { %v503_v9 = vpack.c.bf16 %v493_v2, %v491_v1  ;;  %539 = vst [vmem:[#allocation2 + $0x80] sm:$0xff] %v523_v3 }
 0x10d   : > { %v504_v10 = vpack.c.bf16 %v494_v7, %v492_v6  ;;  %540 = vst [vmem:[#allocation2 + $0x88] sm:$0xff] %v524_v8 }
 0x10e   : > { %511 = vst [vmem:[#allocation2 + $0x20] sm:$0xff] %v503_v9 }
 0x10f   : > { %512 = vst [vmem:[#allocation2 + $0x28] sm:$0xff] %v504_v10  ;;  %v394_v11 = vpop.f32.mrb[12].mxu0  ;;  %v454_v12 = vpop.f32.mrb[12].mxu1 }
 0x110   : > { %v396_v13 = vpop.f32.mrb[13].mxu0  ;;  %v456_v14 = vpop.f32.mrb[13].mxu1  ;;  %v495_v17 = vmul.f32 0.25, %v394_v11 }
 0x111   : > { %v398_v15 = vpop.f32.mrb[14].mxu0  ;;  %v458_v16 = vpop.f32.mrb[14].mxu1  ;;  %v496_v22 = vmul.f32 0.25, %v396_v13 }
 0x112   : > { %v497_v18 = vmul.f32 0.25, %v398_v15  ;;  %v525_v19 = vpack.c.bf16 %v458_v16, %v454_v12  ;;  %v400_v20 = vpop.f32.mrb[15].mxu0  ;;  %v460_v21 = vpop.f32.mrb[15].mxu1 }
 0x113   : > { %v498_v23 = vmul.f32 0.25, %v400_v20  ;;  %v526_v24 = vpack.c.bf16 %v460_v21, %v456_v14 }
 0x114   : > { %v505_v25 = vpack.c.bf16 %v497_v18, %v495_v17  ;;  %541 = vst [vmem:[#allocation2 + $0x90] sm:$0xff] %v525_v19 }
 0x115   : > { %v506_v26 = vpack.c.bf16 %v498_v23, %v496_v22  ;;  %542 = vst [vmem:[#allocation2 + $0x98] sm:$0xff] %v526_v24 }
 0x116   : > { %513 = vst [vmem:[#allocation2 + $0x30] sm:$0xff] %v505_v25 }
 0x117   : > { %514 = vst [vmem:[#allocation2 + $0x38] sm:$0xff] %v506_v26  ;;  %v404_v27 = vpop.f32.mrb[16].mxu0  ;;  %v464_v28 = vpop.f32.mrb[16].mxu1 }
 0x118   : > { %v406_v29 = vpop.f32.mrb[17].mxu0  ;;  %v466_v30 = vpop.f32.mrb[17].mxu1 }
 0x119   : > { %v408_v31 = vpop.f32.mrb[18].mxu0  ;;  %v468_v32 = vpop.f32.mrb[18].mxu1 }
 0x11a   : > { %v515_v33 = vpack.c.bf16 %v408_v31, %v404_v27  ;;  %v527_v34 = vpack.c.bf16 %v468_v32, %v464_v28  ;;  %v410_v35 = vpop.f32.mrb[19].mxu0  ;;  %v470_v36 = vpop.f32.mrb[19].mxu1 }
 0x11b   : > { %v516_v37 = vpack.c.bf16 %v410_v35, %v406_v29  ;;  %v528_v38 = vpack.c.bf16 %v470_v36, %v466_v30 }
 0x11c   : > { %531 = vst [vmem:[#allocation2 + $0x40] sm:$0xff] %v515_v33  ;;  %543 = vst [vmem:[#allocation2 + $0xa0] sm:$0xff] %v527_v34 }
 0x11d   : > { %532 = vst [vmem:[#allocation2 + $0x48] sm:$0xff] %v516_v37  ;;  %544 = vst [vmem:[#allocation2 + $0xa8] sm:$0xff] %v528_v38 }
 0x11f   : > { %v414_v39 = vpop.f32.mrb[20].mxu0  ;;  %v474_v40 = vpop.f32.mrb[20].mxu1 }
 0x120   : > { %v416_v41 = vpop.f32.mrb[21].mxu0  ;;  %v476_v42 = vpop.f32.mrb[21].mxu1 }
 0x121   : > { %v418_v43 = vpop.f32.mrb[22].mxu0  ;;  %v478_v44 = vpop.f32.mrb[22].mxu1 }
 0x122   : > { %v517_v45 = vpack.c.bf16 %v418_v43, %v414_v39  ;;  %v529_v46 = vpack.c.bf16 %v478_v44, %v474_v40  ;;  %v420_v47 = vpop.f32.mrb[23].mxu0  ;;  %v480_v48 = vpop.f32.mrb[23].mxu1 }
 0x123   : > { %v518_v49 = vpack.c.bf16 %v420_v47, %v416_v41  ;;  %v530_v50 = vpack.c.bf16 %v480_v48, %v476_v42 }
 0x124   : > { %533 = vst [vmem:[#allocation2 + $0x50] sm:$0xff] %v517_v45  ;;  %545 = vst [vmem:[#allocation2 + $0xb0] sm:$0xff] %v529_v46 }
 0x125   : > { %534 = vst [vmem:[#allocation2 + $0x58] sm:$0xff] %v518_v49  ;;  %546 = vst [vmem:[#allocation2 + $0xb8] sm:$0xff] %v530_v50 }
 0x126 LB: >> { %v2522_v51 = vmov 0   ;;  %s2714_s30 = sshll.u32 %s2518_s29, 4  ;;  %vm641_vm1 = vcmask 130048   ;;  %s584_s29 = sadd.s32 1, %s2518_s29   ;;  %s2518_s29 = sphi %s2706_s29, %s584_s29  }
 0x127   : >> { %722 = vmatprep.mubr.bf16.mxu0 %v2522_v51  ;;  %842 = vmatprep.mubr.bf16.mxu1 %v2522_v51  ;;  %s593_s5 = sadd.s32 64, %s2714_s30  ;;  %s590_s28 = scalar_lea.vmem [#allocation2], %s2714_s30 }
 0x128   : >> { %s594_s6 = sshra.s32 %s593_s5, 4  ;;  %s601_s9 = sadd.s32 128, %s2714_s30 }
 0x129   : >> { %s2193_s7 = sshll.u32 %s594_s6, 4  ;;  %s602_s10 = sshra.s32 %s601_s9, 4 }
 0x12a   : >> { %s598_s8 = scalar_lea.vmem [#allocation2], %s2193_s7  ;;  %s2194_s11 = sshll.u32 %s602_s10, 4 }
 0x12b   : >> { %s606_s12 = scalar_lea.vmem [#allocation2], %s2194_s11  ;;  %s1556_s13 = sshra.s32 %s2714_s30, 3 }
 0x12c   : >> { %v591_v52 = vld [vmem:[%s590_s28] sm:$0xff]  ;;  %v600_v53 = vld [vmem:[%s598_s8 + $0x8] sm:$0xff]  ;;  %s2168_s14 = sshll.u32 %s1556_s13, 2  ;;  %p581_p11 = scmp.ge.s32.totalorder %s584_s29, 4  }
 0x12d   : >> { %609 = vxpose.xlu0.c.b16.start.end [1/1] (short) %v591_v52, 128  ;;  %v599_v54 = vld [vmem:[%s598_s8] sm:$0xff]  ;;  %690 = vmatprep.subr.bf16.mxu0 %v600_v53  ;;  %v592_v55 = vld [vmem:[%s590_s28 + $0x8] sm:$0xff]  ;;  %s1559_s5 = scalar_lea.vmem %s3139_s2, %s2168_s14  ;;  %s2195_s11 = sshll.u32 (%p581_p11), %s2572_s19, 10 }
 0x12e   : >> { %2251 = vmatprep.subr.bf16.mxu1 %v600_v53  ;;  %691 = vmatpush1.bf16.msra.mxu0 %v599_v54  ;;  %v608_v9 = vld [vmem:[%s606_s12 + $0x8] sm:$0xff]  ;;  %v607_v10 = vld [vmem:[%s606_s12] sm:$0xff]  ;;  %s2039_s12 = sshll.u32 (%p581_p11), %s2704_s23, 4  ;;  %s3089_s20 = scalar_lea.hbm (%p581_p11), %s3141_s4, %s2195_s11  ;;  %s3091_s12 = int_to_ptr.vmem [resolvable:$true] %s2039_s12 }
 0x12f   : >> { %2252 = vmatpush1.bf16.msra.mxu1 %v599_v54  ;;  %s3096_s22 = scalar_lea.sflag (%p581_p11), [#allocation5], %s188_s27  ;;  %s2523_s19 = smov (%p581_p11), [#allocation4]  }
 0x130   : >> { %1363 = vmatprep.subr.bf16.mxu1 %v608_v9  ;;  %s2452_s30 = sshll.u32 (%p581_p11), %s2523_s19, 4  ;;  %s2453_s30 = int_to_ptr.vmem [resolvable:$false] %s2452_s30 }
 0x131   : > { %s2454_s28 = scalar_lea.vmem (%p581_p11), %s2453_s30, 2048  ;;  %p2455_p1 = scmp.lt.s32.totalorder (%p581_p11), %s3091_s12, %s2453_s30 }
 0x14a   : >> { %625 = vxpose.xlu0.c.b16.start.end [1/1] (short) %v592_v55, 128 }
 0x193   : >> { %v617_v56 = vpop.trf.xlu0 }
 0x194   : >> { %2152 = vmatmul.mubr.msk.bf16.vlgmr.msra.gmra.mrb[0].mxu0 %vm641_vm1, %v617_v56 }
 0x195   : >> { %732 = vmatprep.mubr.bf16.mxu0 %v2522_v51 }
 0x197   : >> { %v618_v57 = vpop.trf.xlu0 }
 0x19b   : >> { %v619_v58 = vpop.trf.xlu0 }
 0x19c   : >> { %2153 = vmatmul.mubr.msk.bf16.gmra.mrb[4].mxu0 %vm641_vm1, %v618_v57 }
 0x19d   : >> { %742 = vmatprep.mubr.bf16.mxu0 %v2522_v51 }
 0x19f   : >> { %v620_v59 = vpop.trf.xlu0 }
 0x1a3   : >> { %v621_v60 = vpop.trf.xlu0 }
 0x1a4   : >> { %2154 = vmatmul.mubr.msk.bf16.gmra.mrb[8].mxu0 %vm641_vm1, %v619_v58 }
 0x1a5   : >> { %752 = vmatprep.mubr.bf16.mxu0 %v2522_v51 }
 0x1a7   : >> { %v622_v61 = vpop.trf.xlu0 }
 0x1ab   : >> { %v623_v62 = vpop.trf.xlu0 }
 0x1ac   : >> { %2155 = vmatmul.mubr.msk.bf16.gmra.mrb[12].mxu0 %vm641_vm1, %v620_v59 }
 0x1ad   : >> { %762 = vmatprep.mubr.bf16.mxu0 %v2522_v51 }
 0x1af   : >> { %v624_v63 = vpop.trf.xlu0 }
 0x1b3   : >> { %v633_v1 = vpop.trf.xlu0 }
 0x1b4   : >> { %2156 = vmatmul.mubr.msk.bf16.gmra.mrb[16].mxu0 %vm641_vm1, %v621_v60 }
 0x1b5   : >> { %772 = vmatprep.mubr.bf16.mxu0 %v2522_v51 }
 0x1b7   : >> { %v634_v2 = vpop.trf.xlu0 }
 0x1bb   : >> { %v635_v3 = vpop.trf.xlu0 }
 0x1bc   : >> { %2157 = vmatmul.mubr.msk.bf16.gmra.mrb[20].mxu0 %vm641_vm1, %v622_v61 }
 0x1bd   : >> { %782 = vmatprep.mubr.bf16.mxu0 %v2522_v51 }
 0x1bf   : >> { %v636_v4 = vpop.trf.xlu0 }
 0x1c3   : >> { %v637_v5 = vpop.trf.xlu0 }
 0x1c4   : >> { %2158 = vmatmul.mubr.msk.bf16.gmra.mrb[24].mxu0 %vm641_vm1, %v623_v62  ;;  %2164 = vmatmul.mubr.msk.bf16.vlgmr.msra.gmra.mrb[0].mxu1 %vm641_vm1, %v637_v5 }
 0x1c5   : >> { %792 = vmatprep.mubr.bf16.mxu0 %v2522_v51  ;;  %852 = vmatprep.mubr.bf16.mxu1 %v2522_v51 }
 0x1c6   : >> { %1364 = vmatpush1.bf16.xpose.msra.mxu1 %v607_v10 }
 0x1c7   : >> { %v638_v6 = vpop.trf.xlu0 }
 0x1cb   : >> { %v639_v7 = vpop.trf.xlu0 }
 0x1cc   : >> { %2159 = vmatmul.mubr.msk.bf16.gmra.mrb[28].mxu0 %vm641_vm1, %v624_v63  ;;  %2165 = vmatmul.mubr.msk.bf16.gmra.mrb[4].mxu1 %vm641_vm1, %v638_v6 }
 0x1cd   : >> { %802 = vmatprep.mubr.bf16.mxu0 %v2522_v51  ;;  %862 = vmatprep.mubr.bf16.mxu1 %v2522_v51 }
 0x1cf   : >> { %v640_v8 = vpop.trf.xlu0 }
 0x1d4   : >> { %2160 = vmatmul.mubr.msk.bf16.gmra.mrb[32].mxu0 %vm641_vm1, %v633_v1  ;;  %2166 = vmatmul.mubr.msk.bf16.gmra.mrb[8].mxu1 %vm641_vm1, %v639_v7 }
 0x1d5   : >> { %812 = vmatprep.mubr.bf16.mxu0 %v2522_v51  ;;  %872 = vmatprep.mubr.bf16.mxu1 %v2522_v51 }
 0x1dc   : >> { %2161 = vmatmul.mubr.msk.bf16.gmra.mrb[36].mxu0 %vm641_vm1, %v634_v2  ;;  %2167 = vmatmul.mubr.msk.bf16.gmra.mrb[12].mxu1 %vm641_vm1, %v640_v8 }
 0x1dd   : >> { %822 = vmatprep.mubr.bf16.mxu0 %v2522_v51 }
 0x1e4   : >> { %2162 = vmatmul.mubr.msk.bf16.gmra.mrb[40].mxu0 %vm641_vm1, %v635_v3 }
 0x1e5   : >> { %832 = vmatprep.mubr.bf16.mxu0 %v2522_v51 }
 0x1ec   : >> { %2163 = vmatmul.mubr.msk.bf16.gmra.mrb[44].mxu0 %vm641_vm1, %v636_v4 }
 0x267   : >> { %v2749_v11 = vpop.f32.mrb[0].mxu0 }
 0x268   : >> { %v2751_v12 = vpop.f32.mrb[1].mxu0 }
 0x269   : >> { %v2753_v13 = vpop.f32.mrb[2].mxu0  ;;  %v883_v14 = vmax.f32 %v2749_v11, %v2751_v12 }
 0x26a   : >> { %v2757_v15 = vpop.f32.mrb[3].mxu0 }
 0x26b   : >> { %884 = vmax.xlane.f32.xlu1 %v883_v14  ;;  %v886_v16 = vmax.f32 %v2753_v13, %v2757_v15 }
 0x26f   : >> { %887 = vmax.xlane.f32.xlu1 %v886_v16  ;;  %v2761_v17 = vpop.f32.mrb[4].mxu0 }
 0x270   : >> { %v2763_v18 = vpop.f32.mrb[5].mxu0 }
 0x271   : >> { %v2765_v19 = vpop.f32.mrb[6].mxu0  ;;  %v889_v20 = vmax.f32 %v2761_v17, %v2763_v18 }
 0x272   : >> { %v2769_v21 = vpop.f32.mrb[7].mxu0 }
 0x273   : >> { %890 = vmax.xlane.f32.xlu1 %v889_v20  ;;  %v892_v22 = vmax.f32 %v2765_v19, %v2769_v21 }
 0x277   : >> { %893 = vmax.xlane.f32.xlu1 %v892_v22  ;;  %v2773_v23 = vpop.f32.mrb[8].mxu0 }
 0x278   : >> { %v2775_v24 = vpop.f32.mrb[9].mxu0 }
 0x279   : >> { %v2777_v25 = vpop.f32.mrb[10].mxu0  ;;  %v895_v26 = vmax.f32 %v2773_v23, %v2775_v24 }
 0x27a   : >> { %v2781_v27 = vpop.f32.mrb[11].mxu0 }
 0x27b   : >> { %896 = vmax.xlane.f32.xlu1 %v895_v26  ;;  %v898_v28 = vmax.f32 %v2777_v25, %v2781_v27 }
 0x27f   : >> { %899 = vmax.xlane.f32.xlu1 %v898_v28  ;;  %v2785_v29 = vpop.f32.mrb[12].mxu0 }
 0x280   : >> { %v2787_v30 = vpop.f32.mrb[13].mxu0 }
 0x281   : >> { %v2789_v31 = vpop.f32.mrb[14].mxu0  ;;  %v901_v32 = vmax.f32 %v2785_v29, %v2787_v30 }
 0x282   : >> { %v2793_v33 = vpop.f32.mrb[15].mxu0 }
 0x283   : >> { %902 = vmax.xlane.f32.xlu1 %v901_v32  ;;  %v904_v34 = vmax.f32 %v2789_v31, %v2793_v33 }
 0x287   : >> { %905 = vmax.xlane.f32.xlu1 %v904_v34  ;;  %v2797_v35 = vpop.f32.mrb[16].mxu0 }
 0x288   : >> { %v2799_v36 = vpop.f32.mrb[17].mxu0 }
 0x289   : >> { %v2801_v37 = vpop.f32.mrb[18].mxu0  ;;  %v907_v38 = vmax.f32 %v2797_v35, %v2799_v36 }
 0x28a   : >> { %v2805_v39 = vpop.f32.mrb[19].mxu0 }
 0x28b   : >> { %908 = vmax.xlane.f32.xlu1 %v907_v38  ;;  %v910_v40 = vmax.f32 %v2801_v37, %v2805_v39 }
 0x28d   : >> { %911 = vmax.xlane.f32.xlu0 %v910_v40 }
 0x28f   : >> { %v2809_v41 = vpop.f32.mrb[20].mxu0 }
 0x290   : >> { %v2811_v42 = vpop.f32.mrb[21].mxu0 }
 0x291   : >> { %v2813_v43 = vpop.f32.mrb[22].mxu0  ;;  %v913_v44 = vmax.f32 %v2809_v41, %v2811_v42 }
 0x292   : >> { %v2817_v45 = vpop.f32.mrb[23].mxu0 }
 0x293   : >> { %914 = vmax.xlane.f32.xlu1 %v913_v44  ;;  %v916_v46 = vmax.f32 %v2813_v43, %v2817_v45 }
 0x297   : >> { %917 = vmax.xlane.f32.xlu1 %v916_v46  ;;  %v2821_v47 = vpop.f32.mrb[24].mxu0  ;;  %v2823_v48 = vpop.f32.mrb[0].mxu1 }
 0x298   : >> { %v2825_v49 = vpop.f32.mrb[25].mxu0  ;;  %v2827_v50 = vpop.f32.mrb[1].mxu1 }
 0x299   : >> { %3162 = vst [vmem:[#allocation7_spill] sm:$0xff] %v2827_v50  ;;  %v2829_v51 = vpop.f32.mrb[26].mxu0  ;;  %v919_v52 = vmax.f32 %v2821_v47, %v2825_v49  ;;  %v2833_v53 = vpop.f32.mrb[2].mxu1 }
 0x29a   : >> { %3163 = vst [vmem:[#allocation8_spill] sm:$0xff] %v2833_v53  ;;  %v2837_v55 = vpop.f32.mrb[27].mxu0  ;;  %v2839_v56 = vpop.f32.mrb[3].mxu1 }
 0x29b   : >> { %3164 = vst [vmem:[#allocation9_spill] sm:$0xff] %v2839_v56  ;;  %920 = vmax.xlane.f32.xlu1 %v919_v52  ;;  %v922_v57 = vmax.f32 %v2829_v51, %v2837_v55  ;;  %v958_v58 = vmax.f32 %v2833_v53, %v2839_v56 }
 0x29f   : >> { %923 = vmax.xlane.f32.xlu1 %v922_v57  ;;  %v2845_v59 = vpop.f32.mrb[28].mxu0  ;;  %v2847_v60 = vpop.f32.mrb[4].mxu1 }
 0x2a0   : >> { %3165 = vst [vmem:[#allocation10_spill] sm:$0xff] %v2847_v60  ;;  %v2849_v61 = vpop.f32.mrb[29].mxu0  ;;  %v2851_v62 = vpop.f32.mrb[5].mxu1 }
 0x2a1   : >> { %3166 = vst [vmem:[#allocation11_spill] sm:$0xff] %v2851_v62  ;;  %v2853_v63 = vpop.f32.mrb[30].mxu0  ;;  %v925_v1 = vmax.f32 %v2845_v59, %v2849_v61  ;;  %v2857_v2 = vpop.f32.mrb[6].mxu1  ;;  %v961_v3 = vmax.f32 %v2847_v60, %v2851_v62 }
 0x2a2   : >> { %3167 = vst [vmem:[#allocation12_spill] sm:$0xff] %v2857_v2  ;;  %v2861_v4 = vpop.f32.mrb[31].mxu0  ;;  %v2863_v5 = vpop.f32.mrb[7].mxu1 }
 0x2a3   : >> { %3168 = vst [vmem:[#allocation13_spill] sm:$0xff] %v2863_v5  ;;  %926 = vmax.xlane.f32.xlu1 %v925_v1  ;;  %v928_v6 = vmax.f32 %v2853_v63, %v2861_v4  ;;  %v964_v7 = vmax.f32 %v2857_v2, %v2863_v5 }
 0x2a7   : >> { %929 = vmax.xlane.f32.xlu1 %v928_v6  ;;  %v2869_v8 = vpop.f32.mrb[32].mxu0  ;;  %v2871_v9 = vpop.f32.mrb[8].mxu1 }
 0x2a8   : >> { %3169 = vst [vmem:[#allocation14_spill] sm:$0xff] %v2871_v9  ;;  %v2873_v10 = vpop.f32.mrb[33].mxu0  ;;  %v2875_v14 = vpop.f32.mrb[9].mxu1 }
 0x2a9   : >> { %3170 = vst [vmem:[#allocation15_spill] sm:$0xff] %v2875_v14  ;;  %v2877_v16 = vpop.f32.mrb[34].mxu0  ;;  %v931_v20 = vmax.f32 %v2869_v8, %v2873_v10  ;;  %v2881_v22 = vpop.f32.mrb[10].mxu1  ;;  %v967_v26 = vmax.f32 %v2871_v9, %v2875_v14 }
 0x2aa   : >> { %3171 = vst [vmem:[#allocation16_spill] sm:$0xff] %v2881_v22  ;;  %v2885_v28 = vpop.f32.mrb[35].mxu0  ;;  %v2887_v32 = vpop.f32.mrb[11].mxu1 }
 0x2ab   : >> { %3172 = vst [vmem:[#allocation17_spill] sm:$0xff] %v2887_v32  ;;  %932 = vmax.xlane.f32.xlu1 %v931_v20  ;;  %v934_v34 = vmax.f32 %v2877_v16, %v2885_v28  ;;  %v970_v38 = vmax.f32 %v2881_v22, %v2887_v32 }
 0x2af   : >> { %935 = vmax.xlane.f32.xlu1 %v934_v34  ;;  %v2893_v40 = vpop.f32.mrb[36].mxu0  ;;  %v2895_v44 = vpop.f32.mrb[12].mxu1 }
 0x2b0   : >> { %3173 = vst [vmem:[#allocation18_spill] sm:$0xff] %v2895_v44  ;;  %v2897_v46 = vpop.f32.mrb[37].mxu0  ;;  %v2899_v52 = vpop.f32.mrb[13].mxu1 }
 0x2b1   : >> { %3174 = vst [vmem:[#allocation19_spill] sm:$0xff] %v2899_v52  ;;  %v2901_v57 = vpop.f32.mrb[38].mxu0  ;;  %v937_v1 = vmax.f32 %v2893_v40, %v2897_v46  ;;  %v2905_v6 = vpop.f32.mrb[14].mxu1  ;;  %v973_v20 = vmax.f32 %v2895_v44, %v2899_v52 }
 0x2b2   : >> { %3175 = vst [vmem:[#allocation20_spill] sm:$0xff] %v2905_v6  ;;  %v2909_v0 = vpop.f32.mrb[39].mxu0  ;;  %v2911_v34 = vpop.f32.mrb[15].mxu1 }
 0x2b3   : >> { %3176 = vst [vmem:[#allocation21_spill] sm:$0xff] %v2911_v34  ;;  %938 = vmax.xlane.f32.xlu1 %v937_v1  ;;  %v940_v54 = vmax.f32 %v2901_v57, %v2909_v0  ;;  %v976_v32 = vmax.f32 %v2905_v6, %v2911_v34 }
 0x2b7   : >> { %941 = vmax.xlane.f32.xlu1 %v940_v54  ;;  %v2917_v22 = vpop.f32.mrb[40].mxu0 }
 0x2b8   : >> { %v2919_v14 = vpop.f32.mrb[41].mxu0 }
 0x2b9   : >> { %v2921_v9 = vpop.f32.mrb[42].mxu0  ;;  %v943_v52 = vmax.f32 %v2917_v22, %v2919_v14 }
 0x2ba   : >> { %v2925_v44 = vpop.f32.mrb[43].mxu0 }
 0x2bb   : >> { %944 = vmax.xlane.f32.xlu0 %v943_v52  ;;  %v946_v1 = vmax.f32 %v2921_v9, %v2925_v44  ;;  %v3178_v52 = vmax.f32 %v2823_v48, %v2827_v50 }
 0x2bd   : >> { %947 = vmax.xlane.f32.xlu1 %v946_v1 }
 0x2bf   : >> { %v2929_v5 = vpop.f32.mrb[44].mxu0 }
 0x2c0   : >> { %v2931_v34 = vpop.f32.mrb[45].mxu0 }
 0x2c1   : >> { %v2933_v54 = vpop.f32.mrb[46].mxu0  ;;  %v949_v6 = vmax.f32 %v2929_v5, %v2931_v34 }
 0x2c2   : >> { %v2937_v2 = vpop.f32.mrb[47].mxu0 }
 0x2c3   : >> { %3177 = vst [vmem:[#allocation22_spill] sm:$0xff] %v2937_v2  ;;  %950 = vmax.xlane.f32.xlu0 %v949_v6  ;;  %v952_v62 = vmax.f32 %v2933_v54, %v2937_v2 }
 0x2c5   : >> { %953 = vmax.xlane.f32.xlu1 %v952_v62 }
 0x2c7   : >> { %956 = vmax.xlane.f32.xlu0 %v3178_v52 }
 0x2c9   : >> { %959 = vmax.xlane.f32.xlu1 %v958_v58 }
 0x2cb   : >> { %962 = vmax.xlane.f32.xlu0 %v961_v3 }
 0x2cd   : >> { %965 = vmax.xlane.f32.xlu1 %v964_v7 }
 0x2cf   : >> { %968 = vmax.xlane.f32.xlu0 %v967_v26 }
 0x2d1   : >> { %971 = vmax.xlane.f32.xlu1 %v970_v38 }
 0x2d3   : >> { %974 = vmax.xlane.f32.xlu0 %v973_v20 }
 0x2d5   : >> { %977 = vmax.xlane.f32.xlu1 %v976_v32 }
 0x2f8   : >> { %v885_v1 = vpop.xlane.xlu1 %884 }
 0x2f9   : >> { %v979_v56 = vsub.f32 %v2749_v11, %v885_v1  ;;  %v980_v6 = vsub.f32 %v2751_v12, %v885_v1 }
 0x2fc   : >> { %v888_v60 = vpop.xlane.xlu1 %887 }
 0x2fd   : >> { %v981_v53 = vsub.f32 %v2753_v13, %v888_v60  ;;  %v982_v62 = vsub.f32 %v2757_v15, %v888_v60 }
 0x2ff   : >> { %v1043_v2 = vpack.c.bf16 %v981_v53, %v979_v56  ;;  %v1044_v50 = vpack.c.bf16 %v982_v62, %v980_v6 }
 0x300   : >> { %v891_v52 = vpop.xlane.xlu1 %890 }
 0x301   : >> { %v1076_v58 = vmul.bf16 1069105081, %v1043_v2  ;;  %v1079_v3 = vmul.bf16 1069105081, %v1044_v50  ;;  %v983_v26 = vsub.f32 %v2761_v17, %v891_v52  ;;  %v984_v32 = vsub.f32 %v2763_v18, %v891_v52 }
 0x303   : >> { %2318 = vpow.bf16 %v1076_v58 }
 0x304   : >> { %2320 = vpow.bf16 %v1079_v3  ;;  %v894_v7 = vpop.xlane.xlu1 %893 }
 0x305   : >> { %v985_v11 = vsub.f32 %v2765_v19, %v894_v7  ;;  %v986_v12 = vsub.f32 %v2769_v21, %v894_v7 }
 0x307   : >> { %v1045_v38 = vpack.c.bf16 %v985_v11, %v983_v26  ;;  %v1046_v13 = vpack.c.bf16 %v986_v12, %v984_v32 }
 0x308   : >> { %v897_v20 = vpop.xlane.xlu1 %896 }
 0x309   : >> { %v1082_v15 = vmul.bf16 1069105081, %v1045_v38  ;;  %v1085_v53 = vmul.bf16 1069105081, %v1046_v13  ;;  %v987_v50 = vsub.f32 %v2773_v23, %v897_v20  ;;  %v988_v60 = vsub.f32 %v2775_v24, %v897_v20 }
 0x30b   : >> { %2322 = vpow.bf16 %v1082_v15 }
 0x30c   : >> { %2324 = vpow.bf16 %v1085_v53  ;;  %v900_v56 = vpop.xlane.xlu1 %899 }
 0x30d   : >> { %v989_v17 = vsub.f32 %v2777_v25, %v900_v56  ;;  %v990_v18 = vsub.f32 %v2781_v27, %v900_v56 }
 0x30e   : >> { %v2319_v2 = vpop.eup %2318 }
 0x30f   : >> { %v2321_v19 = vpop.eup %2320  ;;  %v1047_v1 = vpack.c.bf16 %v989_v17, %v987_v50  ;;  %v1048_v21 = vpack.c.bf16 %v990_v18, %v988_v60  ;;  %v1171_v6 = vunpack.c.l.bf16 %v2319_v2  ;;  %v1173_v62 = vunpack.c.h.bf16 %v2319_v2 }
 0x310   : >> { %1395 = vmatprep.mubr.bf16.mxu1 %v2321_v19  ;;  %v903_v52 = vpop.xlane.xlu1 %902  ;;  %v1172_v58 = vunpack.c.l.bf16 %v2321_v19  ;;  %v1174_v3 = vunpack.c.h.bf16 %v2321_v19 }
 0x311   : >> { %v1088_v7 = vmul.bf16 1069105081, %v1047_v1  ;;  %v1091_v26 = vmul.bf16 1069105081, %v1048_v21  ;;  %1396 = vmatmul.mubr.bf16.vlgmr.msra.gmra.mrb[16].mxu1 %v2319_v2  ;;  %v991_v25 = vsub.f32 %v2785_v29, %v903_v52  ;;  %v992_v27 = vsub.f32 %v2787_v30, %v903_v52 }
 0x312   : >> { %v1235_v23 = vadd.f32 %v1172_v58, %v1171_v6  ;;  %v1238_v32 = vadd.f32 %v1174_v3, %v1173_v62 }
 0x313   : >> { %2326 = vpow.bf16 %v1088_v7 }
 0x314   : >> { %2328 = vpow.bf16 %v1091_v26  ;;  %1236 = vadd.xlane.f32.xlu0 %v1235_v23  ;;  %1239 = vadd.xlane.f32.xlu1 %v1238_v32  ;;  %v906_v24 = vpop.xlane.xlu1 %905 }
 0x315   : >> { %v993_v11 = vsub.f32 %v2789_v31, %v906_v24  ;;  %v994_v12 = vsub.f32 %v2793_v33, %v906_v24 }
 0x316   : >> { %v2323_v38 = vpop.eup %2322 }
 0x317   : >> { %v2325_v13 = vpop.eup %2324  ;;  %v1049_v20 = vpack.c.bf16 %v993_v11, %v991_v25  ;;  %v1050_v15 = vpack.c.bf16 %v994_v12, %v992_v27  ;;  %v1175_v53 = vunpack.c.l.bf16 %v2323_v38  ;;  %v1177_v56 = vunpack.c.h.bf16 %v2323_v38 }
 0x318   : >> { %1403 = vmatprep.mubr.bf16.mxu1 %v2325_v13  ;;  %v909_v50 = vpop.xlane.xlu1 %908  ;;  %v1176_v60 = vunpack.c.l.bf16 %v2325_v13  ;;  %v1178_v17 = vunpack.c.h.bf16 %v2325_v13 }
 0x319   : >> { %v1094_v18 = vmul.bf16 1069105081, %v1049_v20  ;;  %v1097_v2 = vmul.bf16 1069105081, %v1050_v15  ;;  %1404 = vmatmul.mubr.bf16.gmra.mrb[20].mxu1 %v2323_v38  ;;  %v995_v29 = vsub.f32 %v2797_v35, %v909_v50  ;;  %v996_v33 = vsub.f32 %v2799_v36, %v909_v50 }
 0x31a   : >> { %v912_v30 = vpop.xlane.xlu0 %911  ;;  %v1241_v19 = vadd.f32 %v1176_v60, %v1175_v53  ;;  %v1244_v31 = vadd.f32 %v1178_v17, %v1177_v56 }
 0x31b   : >> { %2330 = vpow.bf16 %v1094_v18  ;;  %v997_v1 = vsub.f32 %v2801_v37, %v912_v30  ;;  %v998_v21 = vsub.f32 %v2805_v39, %v912_v30 }
 0x31c   : >> { %2332 = vpow.bf16 %v1097_v2  ;;  %1242 = vadd.xlane.f32.xlu0 %v1241_v19  ;;  %1245 = vadd.xlane.f32.xlu1 %v1244_v31 }
 0x31d   : >> { %v1051_v6 = vpack.c.bf16 %v997_v1, %v995_v29  ;;  %v1052_v62 = vpack.c.bf16 %v998_v21, %v996_v33 }
 0x31e   : >> { %v2327_v52 = vpop.eup %2326 }
 0x31f   : >> { %v2329_v58 = vpop.eup %2328  ;;  %v1100_v3 = vmul.bf16 1069105081, %v1051_v6  ;;  %v1103_v7 = vmul.bf16 1069105081, %v1052_v62  ;;  %v1179_v35 = vunpack.c.l.bf16 %v2327_v52  ;;  %v1181_v26 = vunpack.c.h.bf16 %v2327_v52 }
 0x320   : >> { %1411 = vmatprep.mubr.bf16.mxu1 %v2329_v58  ;;  %v915_v23 = vpop.xlane.xlu1 %914  ;;  %v1180_v32 = vunpack.c.l.bf16 %v2329_v58  ;;  %v1182_v24 = vunpack.c.h.bf16 %v2329_v58 }
 0x321   : >> { %2334 = vpow.bf16 %v1100_v3  ;;  %1412 = vmatmul.mubr.bf16.gmra.mrb[24].mxu1 %v2327_v52  ;;  %v999_v25 = vsub.f32 %v2809_v41, %v915_v23  ;;  %v1000_v27 = vsub.f32 %v2811_v42, %v915_v23 }
 0x322   : >> { %2336 = vpow.bf16 %v1103_v7  ;;  %v1247_v36 = vadd.f32 %v1180_v32, %v1179_v35  ;;  %v1250_v37 = vadd.f32 %v1182_v24, %v1181_v26 }
 0x324   : >> { %1248 = vadd.xlane.f32.xlu0 %v1247_v36  ;;  %1251 = vadd.xlane.f32.xlu1 %v1250_v37  ;;  %v918_v39 = vpop.xlane.xlu1 %917 }
 0x325   : >> { %v1001_v11 = vsub.f32 %v2813_v43, %v918_v39  ;;  %v1002_v12 = vsub.f32 %v2817_v45, %v918_v39 }
 0x326   : >> { %v2331_v38 = vpop.eup %2330 }
 0x327   : >> { %v2333_v13 = vpop.eup %2332  ;;  %v1053_v20 = vpack.c.bf16 %v1001_v11, %v999_v25  ;;  %v1054_v15 = vpack.c.bf16 %v1002_v12, %v1000_v27  ;;  %v1183_v53 = vunpack.c.l.bf16 %v2331_v38  ;;  %v1185_v56 = vunpack.c.h.bf16 %v2331_v38 }
 0x328   : >> { %1419 = vmatprep.mubr.bf16.mxu1 %v2333_v13  ;;  %v921_v50 = vpop.xlane.xlu1 %920  ;;  %v1184_v60 = vunpack.c.l.bf16 %v2333_v13  ;;  %v1186_v17 = vunpack.c.h.bf16 %v2333_v13 }
 0x329   : >> { %v1106_v18 = vmul.bf16 1069105081, %v1053_v20  ;;  %v1109_v2 = vmul.bf16 1069105081, %v1054_v15  ;;  %1420 = vmatmul.mubr.bf16.gmra.mrb[28].mxu1 %v2331_v38  ;;  %v1003_v43 = vsub.f32 %v2821_v47, %v921_v50  ;;  %v1004_v45 = vsub.f32 %v2825_v49, %v921_v50 }
 0x32a   : >> { %v1253_v41 = vadd.f32 %v1184_v60, %v1183_v53  ;;  %v1256_v29 = vadd.f32 %v1186_v17, %v1185_v56 }
 0x32b   : >> { %2338 = vpow.bf16 %v1106_v18 }
 0x32c   : >> { %v2335_v42 = vpop.eup %2334  ;;  %2340 = vpow.bf16 %v1109_v2  ;;  %1254 = vadd.xlane.f32.xlu0 %v1253_v41  ;;  %1257 = vadd.xlane.f32.xlu1 %v1256_v29  ;;  %v924_v30 = vpop.xlane.xlu1 %923 }
 0x32d   : >> { %v2337_v19 = vpop.eup %2336  ;;  %v1005_v31 = vsub.f32 %v2829_v51, %v924_v30  ;;  %v1006_v33 = vsub.f32 %v2837_v55, %v924_v30  ;;  %v1189_v1 = vunpack.c.h.bf16 %v2335_v42  ;;  %v1187_v21 = vunpack.c.l.bf16 %v2335_v42 }
 0x32e   : >> { %1427 = vmatprep.mubr.bf16.mxu1 %v2337_v19  ;;  %v1190_v6 = vunpack.c.h.bf16 %v2337_v19  ;;  %v1188_v62 = vunpack.c.l.bf16 %v2337_v19 }
 0x32f   : >> { %v1055_v52 = vpack.c.bf16 %v1005_v31, %v1003_v43  ;;  %v1056_v58 = vpack.c.bf16 %v1006_v33, %v1004_v45 }
 0x330   : >> { %v927_v3 = vpop.xlane.xlu1 %926  ;;  %v1262_v7 = vadd.f32 %v1190_v6, %v1189_v1  ;;  %v1259_v47 = vadd.f32 %v1188_v62, %v1187_v21 }
 0x331   : >> { %v1112_v35 = vmul.bf16 1069105081, %v1055_v52  ;;  %v1115_v49 = vmul.bf16 1069105081, %v1056_v58  ;;  %1428 = vmatmul.mubr.bf16.gmra.mrb[32].mxu1 %v2335_v42  ;;  %v1007_v55 = vsub.f32 %v2845_v59, %v927_v3  ;;  %v1008_v26 = vsub.f32 %v2849_v61, %v927_v3 }
 0x332   : >> { %1263 = vadd.xlane.f32.xlu1 %v1262_v7  ;;  %1260 = vadd.xlane.f32.xlu0 %v1259_v47 }
 0x333   : >> { %2342 = vpow.bf16 %v1112_v35 }
 0x334   : >> { %2344 = vpow.bf16 %v1115_v49  ;;  %v930_v51 = vpop.xlane.xlu1 %929 }
 0x335   : >> { %v1009_v23 = vsub.f32 %v2853_v63, %v930_v51  ;;  %v1010_v32 = vsub.f32 %v2861_v4, %v930_v51 }
 0x336   : >> { %v2339_v24 = vpop.eup %2338 }
 0x337   : >> { %v2341_v36 = vpop.eup %2340  ;;  %v1057_v37 = vpack.c.bf16 %v1009_v23, %v1007_v55  ;;  %v1058_v39 = vpack.c.bf16 %v1010_v32, %v1008_v26  ;;  %v1193_v25 = vunpack.c.h.bf16 %v2339_v24  ;;  %v1191_v27 = vunpack.c.l.bf16 %v2339_v24 }
 0x338   : >> { %1435 = vmatprep.mubr.bf16.mxu1 %v2341_v36  ;;  %v933_v11 = vpop.xlane.xlu1 %932  ;;  %v1194_v12 = vunpack.c.h.bf16 %v2341_v36  ;;  %v1192_v38 = vunpack.c.l.bf16 %v2341_v36 }
 0x339   : >> { %v1118_v13 = vmul.bf16 1069105081, %v1057_v37  ;;  %v1121_v20 = vmul.bf16 1069105081, %v1058_v39  ;;  %1436 = vmatmul.mubr.bf16.gmra.mrb[36].mxu1 %v2339_v24  ;;  %v1011_v63 = vsub.f32 %v2869_v8, %v933_v11  ;;  %v1012_v4 = vsub.f32 %v2873_v10, %v933_v11  ;;  %v2317_v24 = vld [vmem:[%s1559_s5] sm:$0xff]   ;;  %s2448_s5 = scalar_lea.vmem (%p581_p11), %s3091_s12, 1024 }
 0x33a   : >> { %v1268_v59 = vadd.f32 %v1194_v12, %v1193_v25  ;;  %v1265_v15 = vadd.f32 %v1192_v38, %v1191_v27  ;;  %2213 = vmatprep.subr.bf16.mxu0 %v2317_v24  ;;  %p2449_p12 = scmp.ne.s32.totalorder (%p581_p11), %s3091_s12, %s2448_s5  ;;  %p2456_p2 = scmp.lt.s32.totalorder (%p581_p11), %s2454_s28, %s2448_s5 }
 0x33b   : >> { %2346 = vpow.bf16 %v1118_v13  ;;  %2214 = vmatpush3.bf16.msra.mxu0 %v2317_v24 }
 0x33c   : >> { %2348 = vpow.bf16 %v1121_v20  ;;  %1269 = vadd.xlane.f32.xlu1 %v1268_v59  ;;  %1266 = vadd.xlane.f32.xlu0 %v1265_v15  ;;  %v936_v61 = vpop.xlane.xlu1 %935  ;;  %v3179_v15 = vld [vmem:[#allocation22_spill] sm:$0xff]  ;;  %p2450_p13 = pnand (%p581_p11), %p2449_p12, %p2589_p5  ;;  %p2457_p3 = por (%p581_p11), %p2456_p2, %p2455_p1 }
 0x33d   : >> { %v1013_v53 = vsub.f32 %v2877_v16, %v936_v61  ;;  %v1014_v56 = vsub.f32 %v2885_v28, %v936_v61 }
 0x33e   : >> { %v2343_v50 = vpop.eup %2342  ;;  %p2451_p0 = pneg (%p581_p11), %p2450_p13 }
 0x33f   : >> { %v2345_v60 = vpop.eup %2344  ;;  %v1059_v17 = vpack.c.bf16 %v1013_v53, %v1011_v63  ;;  %v1060_v18 = vpack.c.bf16 %v1014_v56, %v1012_v4  ;;  %v1197_v2 = vunpack.c.h.bf16 %v2343_v50  ;;  %v1195_v41 = vunpack.c.l.bf16 %v2343_v50 }
 0x340   : >> { %1443 = vmatprep.mubr.bf16.mxu1 %v2345_v60  ;;  %v939_v29 = vpop.xlane.xlu1 %938  ;;  %v1198_v42 = vunpack.c.h.bf16 %v2345_v60  ;;  %v1196_v43 = vunpack.c.l.bf16 %v2345_v60  ;;  %v3180_v60 = vld [vmem:[#allocation7_spill] sm:$0xff]  ;;  %p2458_p4 = pnand (%p581_p11), %p2457_p3, %p2451_p0 }
 0x341   : >> { %v1124_v45 = vmul.bf16 1069105081, %v1059_v17  ;;  %v1127_v30 = vmul.bf16 1069105081, %v1060_v18  ;;  %1444 = vmatmul.mubr.bf16.gmra.mrb[40].mxu1 %v2343_v50  ;;  %v1015_v16 = vsub.f32 %v2893_v40, %v939_v29  ;;  %v1016_v28 = vsub.f32 %v2897_v46, %v939_v29  ;;  %v3181_v29 = vld [vmem:[#allocation8_spill] sm:$0xff] }
 0x342   : >> { %v1274_v8 = vadd.f32 %v1198_v42, %v1197_v2  ;;  %v1271_v19 = vadd.f32 %v1196_v43, %v1195_v41  ;;  %v3182_v42 = vld [vmem:[#allocation9_spill] sm:$0xff] }
 0x343   : >> { %2350 = vpow.bf16 %v1124_v45 }
 0x344   : >> { %2352 = vpow.bf16 %v1127_v30  ;;  %1275 = vadd.xlane.f32.xlu1 %v1274_v8  ;;  %1272 = vadd.xlane.f32.xlu0 %v1271_v19  ;;  %v942_v10 = vpop.xlane.xlu1 %941 }
 0x345   : >> { %v1017_v31 = vsub.f32 %v2901_v57, %v942_v10  ;;  %v1018_v33 = vsub.f32 %v2909_v0, %v942_v10 }
 0x346   : >> { %v2347_v1 = vpop.eup %2346 }
 0x347   : >> { %v2349_v21 = vpop.eup %2348  ;;  %v1061_v6 = vpack.c.bf16 %v1017_v31, %v1015_v16  ;;  %v1062_v62 = vpack.c.bf16 %v1018_v33, %v1016_v28  ;;  %v1201_v52 = vunpack.c.h.bf16 %v2347_v1  ;;  %v1199_v58 = vunpack.c.l.bf16 %v2347_v1  ;;  %v3184_v31 = vld [vmem:[#allocation11_spill] sm:$0xff] }
 0x348   : >> { %1451 = vmatprep.mubr.bf16.mxu1 %v2349_v21  ;;  %v945_v3 = vpop.xlane.xlu0 %944  ;;  %v1202_v7 = vunpack.c.h.bf16 %v2349_v21  ;;  %v1200_v47 = vunpack.c.l.bf16 %v2349_v21 }
 0x349   : >> { %v1130_v35 = vmul.bf16 1069105081, %v1061_v6  ;;  %v1133_v49 = vmul.bf16 1069105081, %v1062_v62  ;;  %1452 = vmatmul.mubr.bf16.gmra.mrb[44].mxu1 %v2347_v1  ;;  %v1019_v40 = vsub.f32 %v2917_v22, %v945_v3  ;;  %v1020_v0 = vsub.f32 %v2919_v14, %v945_v3 }
 0x34a   : >> { %v948_v46 = vpop.xlane.xlu1 %947  ;;  %v1280_v57 = vadd.f32 %v1202_v7, %v1201_v52  ;;  %v1277_v51 = vadd.f32 %v1200_v47, %v1199_v58  ;;  %v3185_v58 = vld [vmem:[#allocation12_spill] sm:$0xff]  ;;  %v3186_v7 = vld [vmem:[#allocation13_spill] sm:$0xff] }
 0x34b   : >> { %2354 = vpow.bf16 %v1130_v35  ;;  %v1021_v55 = vsub.f32 %v2921_v9, %v948_v46  ;;  %v1022_v26 = vsub.f32 %v2925_v44, %v948_v46 }
 0x34c   : >> { %2356 = vpow.bf16 %v1133_v49  ;;  %1281 = vadd.xlane.f32.xlu1 %v1280_v57  ;;  %1278 = vadd.xlane.f32.xlu0 %v1277_v51  ;;  %v3187_v51 = vld [vmem:[#allocation14_spill] sm:$0xff] }
 0x34d   : >> { %v1063_v23 = vpack.c.bf16 %v1021_v55, %v1019_v40  ;;  %v1064_v32 = vpack.c.bf16 %v1022_v26, %v1020_v0  ;;  %v3188_v55 = vld [vmem:[#allocation15_spill] sm:$0xff] }
 0x34e   : >> { %v2351_v22 = vpop.eup %2350 }
 0x34f   : >> { %v2353_v36 = vpop.eup %2352  ;;  %v1136_v37 = vmul.bf16 1069105081, %v1063_v23  ;;  %v1139_v14 = vmul.bf16 1069105081, %v1064_v32  ;;  %v1205_v39 = vunpack.c.h.bf16 %v2351_v22  ;;  %v1203_v9 = vunpack.c.l.bf16 %v2351_v22 }
 0x350   : >> { %1459 = vmatprep.mubr.bf16.mxu1 %v2353_v36  ;;  %v951_v44 = vpop.xlane.xlu0 %950  ;;  %v1206_v25 = vunpack.c.h.bf16 %v2353_v36  ;;  %v1204_v27 = vunpack.c.l.bf16 %v2353_v36 }
 0x351   : >> { %2358 = vpow.bf16 %v1136_v37  ;;  %1460 = vmatmul.mubr.bf16.gmra.mrb[48].mxu1 %v2351_v22  ;;  %v1023_v13 = vsub.f32 %v2929_v5, %v951_v44  ;;  %v1024_v20 = vsub.f32 %v2931_v34, %v951_v44  ;;  %v3189_v37 = vld [vmem:[#allocation16_spill] sm:$0xff] }
 0x352   : >> { %2360 = vpow.bf16 %v1139_v14  ;;  %v954_v11 = vpop.xlane.xlu1 %953  ;;  %v1286_v12 = vadd.f32 %v1206_v25, %v1205_v39  ;;  %v1283_v38 = vadd.f32 %v1204_v27, %v1203_v9  ;;  %v3190_v39 = vld [vmem:[#allocation17_spill] sm:$0xff] }
 0x353   : >> { %v1025_v59 = vsub.f32 %v2933_v54, %v954_v11  ;;  %v1026_v61 = vsub.f32 %v3179_v15, %v954_v11 }
 0x354   : >> { %1287 = vadd.xlane.f32.xlu1 %v1286_v12  ;;  %1284 = vadd.xlane.f32.xlu0 %v1283_v38  ;;  %v957_v63 = vpop.xlane.xlu0 %956 }
 0x355   : >> { %v1065_v4 = vpack.c.bf16 %v1025_v59, %v1023_v13  ;;  %v1066_v53 = vpack.c.bf16 %v1026_v61, %v1024_v20  ;;  %v1027_v50 = vsub.f32 %v2823_v48, %v957_v63  ;;  %v1028_v17 = vsub.f32 %v3180_v60, %v957_v63  ;;  %v3183_v48 = vld [vmem:[#allocation10_spill] sm:$0xff]  ;;  %v3192_v59 = vld [vmem:[#allocation19_spill] sm:$0xff]  ;;  %v3194_v60 = vld [vmem:[#allocation21_spill] sm:$0xff] }
 0x356   : >> { %v2355_v56 = vpop.eup %2354  ;;  %v960_v18 = vpop.xlane.xlu1 %959  ;;  %v3191_v13 = vld [vmem:[#allocation18_spill] sm:$0xff] }
 0x357   : >> { %v2357_v2 = vpop.eup %2356  ;;  %v1142_v41 = vmul.bf16 1069105081, %v1065_v4  ;;  %v1145_v5 = vmul.bf16 1069105081, %v1066_v53  ;;  %v1029_v34 = vsub.f32 %v3181_v29, %v960_v18  ;;  %v1030_v54 = vsub.f32 %v3182_v42, %v960_v18 }
 0x358   : >> { %1467 = vmatprep.mubr.bf16.mxu1 %v2357_v2  ;;  %v963_v43 = vpop.xlane.xlu0 %962  ;;  %v1209_v45 = vunpack.c.h.bf16 %v2355_v56  ;;  %v1210_v30 = vunpack.c.h.bf16 %v2357_v2  ;;  %v1207_v8 = vunpack.c.l.bf16 %v2355_v56  ;;  %v1208_v19 = vunpack.c.l.bf16 %v2357_v2 }
 0x359   : >> { %2362 = vpow.bf16 %v1142_v41  ;;  %v1067_v10 = vpack.c.bf16 %v1029_v34, %v1027_v50  ;;  %v1068_v16 = vpack.c.bf16 %v1030_v54, %v1028_v17  ;;  %1468 = vmatmul.mubr.bf16.gmra.mrb[52].mxu1 %v2355_v56  ;;  %v1031_v28 = vsub.f32 %v3183_v48, %v963_v43  ;;  %v3193_v56 = vld [vmem:[#allocation20_spill] sm:$0xff] }
 0x35a   : >> { %2364 = vpow.bf16 %v1145_v5  ;;  %v1032_v33 = vsub.f32 %v3184_v31, %v963_v43  ;;  %v966_v1 = vpop.xlane.xlu1 %965  ;;  %v1292_v21 = vadd.f32 %v1210_v30, %v1209_v45  ;;  %v1289_v6 = vadd.f32 %v1208_v19, %v1207_v8 }
 0x35b   : >> { %v1148_v62 = vmul.bf16 1069105081, %v1067_v10  ;;  %v1151_v52 = vmul.bf16 1069105081, %v1068_v16  ;;  %v1033_v3 = vsub.f32 %v3185_v58, %v966_v1  ;;  %v1034_v47 = vsub.f32 %v3186_v7, %v966_v1 }
 0x35c   : >> { %v2359_v35 = vpop.eup %2358  ;;  %1293 = vadd.xlane.f32.xlu1 %v1292_v21  ;;  %1290 = vadd.xlane.f32.xlu0 %v1289_v6  ;;  %v969_v49 = vpop.xlane.xlu0 %968 }
 0x35d   : >> { %v2361_v40 = vpop.eup %2360  ;;  %2366 = vpow.bf16 %v1148_v62  ;;  %v1069_v46 = vpack.c.bf16 %v1033_v3, %v1031_v28  ;;  %v1070_v57 = vpack.c.bf16 %v1034_v47, %v1032_v33  ;;  %v1035_v0 = vsub.f32 %v3187_v51, %v969_v49 }
 0x35e   : >> { %2368 = vpow.bf16 %v1151_v52  ;;  %v1036_v26 = vsub.f32 %v3188_v55, %v969_v49  ;;  %1475 = vmatprep.mubr.bf16.mxu1 %v2361_v40  ;;  %v972_v23 = vpop.xlane.xlu1 %971  ;;  %v1213_v32 = vunpack.c.h.bf16 %v2359_v35  ;;  %v1214_v22 = vunpack.c.h.bf16 %v2361_v40 }
 0x35f   : >> { %v1154_v24 = vmul.bf16 1069105081, %v1069_v46  ;;  %v1157_v36 = vmul.bf16 1069105081, %v1070_v57  ;;  %v1037_v14 = vsub.f32 %v3189_v37, %v972_v23  ;;  %v1038_v9 = vsub.f32 %v3190_v39, %v972_v23 }
 0x360   : >> { %v975_v44 = vpop.xlane.xlu0 %974  ;;  %v1298_v25 = vadd.f32 %v1214_v22, %v1213_v32  ;;  %v1211_v27 = vunpack.c.l.bf16 %v2359_v35  ;;  %v1212_v11 = vunpack.c.l.bf16 %v2361_v40 }
 0x361   : >> { %2370 = vpow.bf16 %v1154_v24  ;;  %v1071_v12 = vpack.c.bf16 %v1037_v14, %v1035_v0  ;;  %v1072_v38 = vpack.c.bf16 %v1038_v9, %v1036_v26  ;;  %1476 = vmatmul.mubr.bf16.gmra.mrb[56].mxu1 %v2359_v35  ;;  %v1039_v20 = vsub.f32 %v3191_v13, %v975_v44 }
 0x362   : >> { %2372 = vpow.bf16 %v1157_v36  ;;  %v1040_v15 = vsub.f32 %v3192_v59, %v975_v44  ;;  %1299 = vadd.xlane.f32.xlu1 %v1298_v25  ;;  %v1295_v61 = vadd.f32 %v1212_v11, %v1211_v27  ;;  %v978_v63 = vpop.xlane.xlu1 %977 }
 0x363   : >> { %v1160_v4 = vmul.bf16 1069105081, %v1071_v12  ;;  %v1163_v53 = vmul.bf16 1069105081, %v1072_v38  ;;  %v1041_v50 = vsub.f32 %v3193_v56, %v978_v63  ;;  %v1042_v17 = vsub.f32 %v3194_v60, %v978_v63 }
 0x364   : >> { %v2363_v18 = vpop.eup %2362  ;;  %1296 = vadd.xlane.f32.xlu0 %v1295_v61 }
 0x365   : >> { %v2365_v2 = vpop.eup %2364  ;;  %2374 = vpow.bf16 %v1160_v4  ;;  %v1073_v41 = vpack.c.bf16 %v1041_v50, %v1039_v20  ;;  %v1074_v5 = vpack.c.bf16 %v1042_v17, %v1040_v15  ;;  %v1217_v29 = vunpack.c.h.bf16 %v2363_v18 }
 0x366   : >> { %2376 = vpow.bf16 %v1163_v53  ;;  %1483 = vmatprep.mubr.bf16.mxu1 %v2365_v2  ;;  %v1218_v34 = vunpack.c.h.bf16 %v2365_v2  ;;  %v1215_v42 = vunpack.c.l.bf16 %v2363_v18  ;;  %v1216_v54 = vunpack.c.l.bf16 %v2365_v2 }
 0x367   : >> { %v1166_v43 = vmul.bf16 1069105081, %v1073_v41  ;;  %v1169_v45 = vmul.bf16 1069105081, %v1074_v5 }
 0x368   : >> { %v2367_v30 = vpop.eup %2366  ;;  %v1304_v8 = vadd.f32 %v1218_v34, %v1217_v29  ;;  %v1301_v19 = vadd.f32 %v1216_v54, %v1215_v42 }
 0x369   : >> { %v2369_v10 = vpop.eup %2368  ;;  %2378 = vpow.bf16 %v1166_v43  ;;  %1484 = vmatmul.mubr.bf16.gmra.mrb[60].mxu1 %v2363_v18  ;;  %v1221_v16 = vunpack.c.h.bf16 %v2367_v30  ;;  %v1219_v48 = vunpack.c.l.bf16 %v2367_v30 }
 0x36a   : >> { %2380 = vpow.bf16 %v1169_v45  ;;  %1305 = vadd.xlane.f32.xlu1 %v1304_v8  ;;  %1302 = vadd.xlane.f32.xlu0 %v1301_v19  ;;  %v1222_v28 = vunpack.c.h.bf16 %v2369_v10  ;;  %v1220_v31 = vunpack.c.l.bf16 %v2369_v10 }
 0x36b   : >> { %1491 = vmatprep.mubr.bf16.mxu1 %v2369_v10 }
 0x36c   : >> { %v2371_v33 = vpop.eup %2370  ;;  %v1310_v1 = vadd.f32 %v1222_v28, %v1221_v16  ;;  %v1307_v21 = vadd.f32 %v1220_v31, %v1219_v48 }
 0x36d   : >> { %v2373_v6 = vpop.eup %2372  ;;  %v1225_v62 = vunpack.c.h.bf16 %v2371_v33  ;;  %v1223_v52 = vunpack.c.l.bf16 %v2371_v33 }
 0x36e   : >> { %1311 = vadd.xlane.f32.xlu1 %v1310_v1  ;;  %1308 = vadd.xlane.f32.xlu0 %v1307_v21  ;;  %v1226_v58 = vunpack.c.h.bf16 %v2373_v6  ;;  %v1224_v3 = vunpack.c.l.bf16 %v2373_v6 }
 0x370   : >> { %v2375_v7 = vpop.eup %2374  ;;  %v1316_v47 = vadd.f32 %v1226_v58, %v1225_v62  ;;  %v1313_v35 = vadd.f32 %v1224_v3, %v1223_v52 }
 0x371   : >> { %v2377_v49 = vpop.eup %2376  ;;  %1492 = vmatmul.mubr.bf16.gmra.mrb[64].mxu1 %v2367_v30  ;;  %v1229_v40 = vunpack.c.h.bf16 %v2375_v7  ;;  %v1227_v46 = vunpack.c.l.bf16 %v2375_v7 }
 0x372   : >> { %1499 = vmatprep.mubr.bf16.mxu1 %v2373_v6  ;;  %1317 = vadd.xlane.f32.xlu1 %v1316_v47  ;;  %v1230_v57 = vunpack.c.h.bf16 %v2377_v49  ;;  %v1228_v51 = vunpack.c.l.bf16 %v2377_v49 }
 0x373   : >> { %1314 = vadd.xlane.f32.xlu0 %v1313_v35 }
 0x374   : >> { %v2379_v0 = vpop.eup %2378  ;;  %v1322_v55 = vadd.f32 %v1230_v57, %v1229_v40  ;;  %v1319_v26 = vadd.f32 %v1228_v51, %v1227_v46 }
 0x375   : >> { %v2381_v23 = vpop.eup %2380  ;;  %v1233_v32 = vunpack.c.h.bf16 %v2379_v0  ;;  %v1231_v22 = vunpack.c.l.bf16 %v2379_v0 }
 0x376   : >> { %1323 = vadd.xlane.f32.xlu1 %v1322_v55  ;;  %v1234_v24 = vunpack.c.h.bf16 %v2381_v23  ;;  %v1232_v36 = vunpack.c.l.bf16 %v2381_v23 }
 0x377   : >> { %1320 = vadd.xlane.f32.xlu0 %v1319_v26 }
 0x378   : >> { %v1328_v37 = vadd.f32 %v1234_v24, %v1233_v32  ;;  %v1325_v14 = vadd.f32 %v1232_v36, %v1231_v22 }
 0x379   : >> { %1500 = vmatmul.mubr.bf16.gmra.mrb[68].mxu1 %v2371_v33 }
 0x37a   : >> { %1507 = vmatprep.mubr.bf16.mxu1 %v2377_v49  ;;  %1329 = vadd.xlane.f32.xlu1 %v1328_v37 }
 0x37b   : >> { %1326 = vadd.xlane.f32.xlu0 %v1325_v14 }
 0x381   : >> { %1508 = vmatmul.mubr.bf16.gmra.mrb[72].mxu1 %v2375_v7 }
 0x382   : >> { %1515 = vmatprep.mubr.bf16.mxu1 %v2381_v23 }
 0x389   : >> { %1516 = vmatmul.mubr.bf16.gmra.mrb[76].mxu1 %v2379_v0 }
 0x3a1   : >> { %v1240_v39 = vpop.xlane.xlu1 %1239  ;;  %v1237_v9 = vpop.xlane.xlu0 %1236 }
 0x3a2   : >> { %2382 = vrcp.f32 %v1240_v39 }
 0x3a3   : >> { %2384 = vrcp.f32 %v1237_v9 }
 0x3a9   : >> { %v1246_v44 = vpop.xlane.xlu1 %1245  ;;  %v1243_v25 = vpop.xlane.xlu0 %1242 }
 0x3aa   : >> { %2386 = vrcp.f32 %v1246_v44 }
 0x3ab   : >> { %2388 = vrcp.f32 %v1243_v25 }
 0x3ac   : >> { %v2383_v11 = vpop.eup %2382 }
 0x3ad   : >> { %v2385_v38 = vpop.eup %2384 }
 0x3b1   : >> { %v1252_v61 = vpop.xlane.xlu1 %1251  ;;  %v1249_v63 = vpop.xlane.xlu0 %1248 }
 0x3b2   : >> { %2390 = vrcp.f32 %v1252_v61 }
 0x3b3   : >> { %2392 = vrcp.f32 %v1249_v63 }
 0x3b4   : >> { %v2387_v56 = vpop.eup %2386 }
 0x3b5   : >> { %v2389_v60 = vpop.eup %2388 }
 0x3b9   : >> { %v1258_v5 = vpop.xlane.xlu1 %1257  ;;  %v1255_v29 = vpop.xlane.xlu0 %1254 }
 0x3ba   : >> { %2394 = vrcp.f32 %v1258_v5 }
 0x3bb   : >> { %2396 = vrcp.f32 %v1255_v29 }
 0x3bc   : >> { %v2391_v54 = vpop.eup %2390 }
 0x3bd   : >> { %v2393_v45 = vpop.eup %2392 }
 0x3bf   : >> { %v1264_v16 = vpop.xlane.xlu1 %1263  ;;  %v1261_v48 = vpop.xlane.xlu0 %1260 }
 0x3c0   : >> { %2398 = vrcp.f32 %v1264_v16 }
 0x3c1   : >> { %2400 = vrcp.f32 %v1261_v48 }
 0x3c4   : >> { %v2395_v33 = vpop.eup %2394 }
 0x3c5   : >> { %v2397_v21 = vpop.eup %2396 }
 0x3c9   : >> { %v1270_v3 = vpop.xlane.xlu1 %1269  ;;  %v1267_v7 = vpop.xlane.xlu0 %1266 }
 0x3ca   : >> { %2402 = vrcp.f32 %v1270_v3  ;;  %v2399_v49 = vpop.eup %2398 }
 0x3cb   : >> { %2404 = vrcp.f32 %v1267_v7  ;;  %v2401_v46 = vpop.eup %2400 }
 0x3d1   : >> { %v1276_v26 = vpop.xlane.xlu1 %1275  ;;  %v1273_v23 = vpop.xlane.xlu0 %1272 }
 0x3d2   : >> { %2406 = vrcp.f32 %v1276_v26 }
 0x3d3   : >> { %2408 = vrcp.f32 %v1273_v23 }
 0x3d4   : >> { %v2403_v24 = vpop.eup %2402 }
 0x3d5   : >> { %v2405_v37 = vpop.eup %2404 }
 0x3d9   : >> { %v1282_v25 = vpop.xlane.xlu1 %1281 }
 0x3da   : >> { %2410 = vrcp.f32 %v1282_v25 }
 0x3e4   : >> { %v1397_v27 = vpop.f32.mrb[16].mxu1 }
 0x3e5   : >> { %v1399_v12 = vpop.f32.mrb[17].mxu1  ;;  %v1524_v20 = vmul.f32 %v2385_v38, %v1397_v27  ;;  %v1279_v27 = vpop.xlane.xlu0 %1278 }
 0x3e6   : >> { %v1400_v13 = vpop.f32.mrb[18].mxu1  ;;  %2412 = vrcp.f32 %v1279_v27  ;;  %v2407_v38 = vpop.eup %2406 }
 0x3e7   : >> { %v1525_v59 = vmul.f32 %v2383_v11, %v1400_v13  ;;  %v1402_v15 = vpop.f32.mrb[19].mxu1 }
 0x3e9   : >> { %v1594_v4 = vpack.c.bf16 %v1525_v59, %v1524_v20  ;;  %v2409_v20 = vpop.eup %2408 }
 0x3eb   : >> { %2215 = vmatprep.mubr.msk.bf16.mxu0 %vm641_vm1, %v1594_v4  ;;  %v1288_v4 = vpop.xlane.xlu1 %1287 }
 0x3ec   : >> { %v1405_v53 = vpop.f32.mrb[20].mxu1  ;;  %2414 = vrcp.f32 %v1288_v4 }
 0x3ed   : >> { %v1407_v50 = vpop.f32.mrb[21].mxu1  ;;  %v1526_v18 = vmul.f32 %v2389_v60, %v1405_v53  ;;  %v1285_v53 = vpop.xlane.xlu0 %1284 }
 0x3ee   : >> { %v1408_v17 = vpop.f32.mrb[22].mxu1  ;;  %2416 = vrcp.f32 %v1285_v53  ;;  %v2411_v60 = vpop.eup %2410 }
 0x3ef   : >> { %v1527_v2 = vmul.f32 %v2387_v56, %v1408_v17  ;;  %v1410_v41 = vpop.f32.mrb[23].mxu1 }
 0x3f1   : >> { %v1595_v34 = vpack.c.bf16 %v1527_v2, %v1526_v18  ;;  %v2413_v18 = vpop.eup %2412 }
 0x3f3   : >> { %2216 = vmatmul.mubr.msk.bf16.vlgmr.msra.gmra.mrb[48].mxu0 %vm641_vm1, %v1595_v34  ;;  %v1294_v34 = vpop.xlane.xlu1 %1293 }
 0x3f4   : >> { %v1413_v42 = vpop.f32.mrb[24].mxu1  ;;  %2418 = vrcp.f32 %v1294_v34 }
 0x3f5   : >> { %v1415_v43 = vpop.f32.mrb[25].mxu1  ;;  %v1528_v8 = vmul.f32 %v2393_v45, %v1413_v42  ;;  %v1291_v42 = vpop.xlane.xlu0 %1290 }
 0x3f6   : >> { %v1416_v30 = vpop.f32.mrb[26].mxu1  ;;  %2420 = vrcp.f32 %v1291_v42  ;;  %v2415_v45 = vpop.eup %2414 }
 0x3f7   : >> { %v1529_v19 = vmul.f32 %v2391_v54, %v1416_v30  ;;  %v1418_v10 = vpop.f32.mrb[27].mxu1 }
 0x3f9   : >> { %v1596_v28 = vpack.c.bf16 %v1529_v19, %v1528_v8  ;;  %v2417_v8 = vpop.eup %2416 }
 0x3fb   : >> { %2219 = vmatprep.mubr.msk.bf16.mxu0 %vm641_vm1, %v1596_v28  ;;  %v1300_v28 = vpop.xlane.xlu1 %1299 }
 0x3fc   : >> { %v1421_v31 = vpop.f32.mrb[28].mxu1  ;;  %2422 = vrcp.f32 %v1300_v28 }
 0x3fd   : >> { %v1423_v1 = vpop.f32.mrb[29].mxu1  ;;  %v1530_v62 = vmul.f32 %v2397_v21, %v1421_v31  ;;  %v1297_v31 = vpop.xlane.xlu0 %1296 }
 0x3fe   : >> { %v1424_v6 = vpop.f32.mrb[30].mxu1  ;;  %2424 = vrcp.f32 %v1297_v31  ;;  %v2419_v21 = vpop.eup %2418 }
 0x3ff   : >> { %v1531_v52 = vmul.f32 %v2395_v33, %v1424_v6  ;;  %v1426_v58 = vpop.f32.mrb[31].mxu1 }
 0x401   : >> { %v1597_v47 = vpack.c.bf16 %v1531_v52, %v1530_v62  ;;  %v2421_v62 = vpop.eup %2420 }
 0x403   : >> { %2220 = vmatmul.mubr.msk.bf16.gmra.mrb[52].mxu0 %vm641_vm1, %v1597_v47  ;;  %v1306_v47 = vpop.xlane.xlu1 %1305 }
 0x404   : >> { %v1429_v35 = vpop.f32.mrb[32].mxu1  ;;  %2426 = vrcp.f32 %v1306_v47 }
 0x405   : >> { %v1431_v40 = vpop.f32.mrb[33].mxu1  ;;  %v1532_v51 = vmul.f32 %v2401_v46, %v1429_v35  ;;  %v1303_v35 = vpop.xlane.xlu0 %1302 }
 0x406   : >> { %v1432_v57 = vpop.f32.mrb[34].mxu1  ;;  %2428 = vrcp.f32 %v1303_v35  ;;  %v2423_v46 = vpop.eup %2422  ;;  %v1564_v35 = vld [vmem:[#allocation3 + $0x10] sm:$0xff] }
 0x407   : >> { %v1533_v0 = vmul.f32 %v2399_v49, %v1432_v57  ;;  %v1434_v55 = vpop.f32.mrb[35].mxu1 }
 0x409   : >> { %v1598_v32 = vpack.c.bf16 %v1533_v0, %v1532_v51  ;;  %v2425_v51 = vpop.eup %2424 }
 0x40b   : >> { %2223 = vmatprep.mubr.msk.bf16.mxu0 %vm641_vm1, %v1598_v32  ;;  %v1312_v32 = vpop.xlane.xlu1 %1311 }
 0x40c   : >> { %v1437_v22 = vpop.f32.mrb[36].mxu1  ;;  %2430 = vrcp.f32 %v1312_v32 }
 0x40d   : >> { %v1439_v36 = vpop.f32.mrb[37].mxu1  ;;  %v1534_v39 = vmul.f32 %v2405_v37, %v1437_v22  ;;  %v1309_v22 = vpop.xlane.xlu0 %1308 }
 0x40e   : >> { %v1440_v14 = vpop.f32.mrb[38].mxu1  ;;  %2432 = vrcp.f32 %v1309_v22  ;;  %v2427_v37 = vpop.eup %2426 }
 0x40f   : >> { %v1535_v9 = vmul.f32 %v2403_v24, %v1440_v14  ;;  %v1442_v44 = vpop.f32.mrb[39].mxu1 }
 0x411   : >> { %v1599_v11 = vpack.c.bf16 %v1535_v9, %v1534_v39  ;;  %v2429_v39 = vpop.eup %2428 }
 0x413   : >> { %2224 = vmatmul.mubr.msk.bf16.gmra.mrb[56].mxu0 %vm641_vm1, %v1599_v11  ;;  %v1318_v11 = vpop.xlane.xlu1 %1317 }
 0x414   : >> { %v1445_v12 = vpop.f32.mrb[40].mxu1  ;;  %2434 = vrcp.f32 %v1318_v11 }
 0x415   : >> { %v1447_v13 = vpop.f32.mrb[41].mxu1  ;;  %v1536_v15 = vmul.f32 %v2409_v20, %v1445_v12  ;;  %v1315_v12 = vpop.xlane.xlu0 %1314 }
 0x416   : >> { %v1448_v59 = vpop.f32.mrb[42].mxu1  ;;  %2436 = vrcp.f32 %v1315_v12  ;;  %v2431_v20 = vpop.eup %2430 }
 0x417   : >> { %v1537_v61 = vmul.f32 %v2407_v38, %v1448_v59  ;;  %v1450_v63 = vpop.f32.mrb[43].mxu1 }
 0x419   : >> { %v1600_v56 = vpack.c.bf16 %v1537_v61, %v1536_v15  ;;  %v2433_v15 = vpop.eup %2432 }
 0x41b   : >> { %2227 = vmatprep.mubr.msk.bf16.mxu0 %vm641_vm1, %v1600_v56  ;;  %v1324_v56 = vpop.xlane.xlu1 %1323 }
 0x41c   : >> { %v1453_v50 = vpop.f32.mrb[44].mxu1  ;;  %2438 = vrcp.f32 %v1324_v56 }
 0x41d   : >> { %v1455_v17 = vpop.f32.mrb[45].mxu1  ;;  %v1538_v41 = vmul.f32 %v2413_v18, %v1453_v50  ;;  %v1321_v50 = vpop.xlane.xlu0 %1320 }
 0x41e   : >> { %v1456_v2 = vpop.f32.mrb[46].mxu1  ;;  %2440 = vrcp.f32 %v1321_v50  ;;  %v2435_v18 = vpop.eup %2434 }
 0x41f   : >> { %v1539_v5 = vmul.f32 %v2411_v60, %v1456_v2  ;;  %v1458_v29 = vpop.f32.mrb[47].mxu1 }
 0x421   : >> { %v1601_v54 = vpack.c.bf16 %v1539_v5, %v1538_v41  ;;  %v2437_v41 = vpop.eup %2436 }
 0x423   : >> { %2228 = vmatmul.mubr.msk.bf16.gmra.mrb[60].mxu0 %vm641_vm1, %v1601_v54  ;;  %v1330_v54 = vpop.xlane.xlu1 %1329 }
 0x424   : >> { %v1461_v43 = vpop.f32.mrb[48].mxu1  ;;  %2442 = vrcp.f32 %v1330_v54 }
 0x425   : >> { %v1463_v30 = vpop.f32.mrb[49].mxu1  ;;  %v1540_v10 = vmul.f32 %v2417_v8, %v1461_v43  ;;  %v1327_v43 = vpop.xlane.xlu0 %1326 }
 0x426   : >> { %v1464_v19 = vpop.f32.mrb[50].mxu1  ;;  %2444 = vrcp.f32 %v1327_v43  ;;  %v2439_v8 = vpop.eup %2438 }
 0x427   : >> { %v1541_v16 = vmul.f32 %v2415_v45, %v1464_v19  ;;  %v1466_v48 = vpop.f32.mrb[51].mxu1 }
 0x429   : >> { %v1602_v33 = vpack.c.bf16 %v1541_v16, %v1540_v10  ;;  %v2441_v10 = vpop.eup %2440 }
 0x42b   : >> { %2231 = vmatprep.mubr.msk.bf16.mxu0 %vm641_vm1, %v1602_v33 }
 0x42c   : >> { %v1469_v1 = vpop.f32.mrb[52].mxu1 }
 0x42d   : >> { %v1471_v6 = vpop.f32.mrb[53].mxu1  ;;  %v1542_v58 = vmul.f32 %v2421_v62, %v1469_v1 }
 0x42e   : >> { %v1472_v52 = vpop.f32.mrb[54].mxu1 }
 0x42f   : >> { %v1543_v3 = vmul.f32 %v2419_v21, %v1472_v52  ;;  %v1474_v7 = vpop.f32.mrb[55].mxu1  ;;  %v2443_v21 = vpop.eup %2442 }
 0x430   : >> { %v2445_v62 = vpop.eup %2444 }
 0x431   : >> { %v1603_v49 = vpack.c.bf16 %v1543_v3, %v1542_v58 }
 0x433   : >> { %2232 = vmatmul.mubr.msk.bf16.gmra.mrb[64].mxu0 %vm641_vm1, %v1603_v49  ;;  %v1562_v49 = vld [vmem:[#allocation3] sm:$0xff] }
 0x434   : >> { %v1477_v40 = vpop.f32.mrb[56].mxu1 }
 0x435   : >> { %v1479_v57 = vpop.f32.mrb[57].mxu1  ;;  %v1544_v55 = vmul.f32 %v2425_v51, %v1477_v40 }
 0x436   : >> { %v1480_v0 = vpop.f32.mrb[58].mxu1 }
 0x437   : >> { %v1545_v26 = vmul.f32 %v2423_v46, %v1480_v0  ;;  %v1482_v23 = vpop.f32.mrb[59].mxu1  ;;  %v1565_v46 = vld [vmem:[#allocation3 + $0x18] sm:$0xff]  ;;  %v1563_v0 = vld [vmem:[#allocation3 + $0x8] sm:$0xff] }
 0x439   : >> { %v1604_v24 = vpack.c.bf16 %v1545_v26, %v1544_v55 }
 0x43b   : >> { %2235 = vmatprep.mubr.msk.bf16.mxu0 %vm641_vm1, %v1604_v24  ;;  %v1568_v24 = vld [vmem:[#allocation3 + $0x30] sm:$0xff] }
 0x43c   : >> { %v1485_v36 = vpop.f32.mrb[60].mxu1 }
 0x43d   : >> { %v1487_v14 = vpop.f32.mrb[61].mxu1  ;;  %v1546_v44 = vmul.f32 %v2429_v39, %v1485_v36  ;;  %v1566_v36 = vld [vmem:[#allocation3 + $0x20] sm:$0xff] }
 0x43e   : >> { %v1488_v9 = vpop.f32.mrb[62].mxu1  ;;  %v1569_v14 = vld [vmem:[#allocation3 + $0x38] sm:$0xff] }
 0x43f   : >> { %v1547_v25 = vmul.f32 %v2427_v37, %v1488_v9  ;;  %v1490_v27 = vpop.f32.mrb[63].mxu1 }
 0x441   : >> { %v1605_v38 = vpack.c.bf16 %v1547_v25, %v1546_v44  ;;  %v1567_v44 = vld [vmem:[#allocation3 + $0x28] sm:$0xff] }
 0x443   : >> { %2236 = vmatmul.mubr.msk.bf16.gmra.mrb[68].mxu0 %vm641_vm1, %v1605_v38 }
 0x444   : >> { %v1493_v13 = vpop.f32.mrb[64].mxu1 }
 0x445   : >> { %v1495_v59 = vpop.f32.mrb[65].mxu1  ;;  %v1548_v63 = vmul.f32 %v2433_v15, %v1493_v13  ;;  %v1572_v13 = vld [vmem:[#allocation3 + $0x50] sm:$0xff]  ;;  %v1573_v15 = vld [vmem:[#allocation3 + $0x58] sm:$0xff] }
 0x446   : >> { %v1496_v61 = vpop.f32.mrb[66].mxu1 }
 0x447   : >> { %v1549_v4 = vmul.f32 %v2431_v20, %v1496_v61  ;;  %v1498_v53 = vpop.f32.mrb[67].mxu1  ;;  %v1570_v20 = vld [vmem:[#allocation3 + $0x40] sm:$0xff] }
 0x449   : >> { %v1606_v60 = vpack.c.bf16 %v1549_v4, %v1548_v63  ;;  %v1571_v4 = vld [vmem:[#allocation3 + $0x48] sm:$0xff] }
 0x44b   : >> { %2239 = vmatprep.mubr.msk.bf16.mxu0 %vm641_vm1, %v1606_v60 }
 0x44c   : >> { %v1501_v17 = vpop.f32.mrb[68].mxu1 }
 0x44d   : >> { %v1503_v2 = vpop.f32.mrb[69].mxu1  ;;  %v1550_v29 = vmul.f32 %v2437_v41, %v1501_v17 }
 0x44e   : >> { %v1504_v5 = vpop.f32.mrb[70].mxu1  ;;  %v1574_v2 = vld [vmem:[#allocation3 + $0x60] sm:$0xff] }
 0x44f   : >> { %v1551_v34 = vmul.f32 %v2435_v18, %v1504_v5  ;;  %v1506_v42 = vpop.f32.mrb[71].mxu1  ;;  %v1576_v18 = vld [vmem:[#allocation3 + $0x70] sm:$0xff]  ;;  %v1577_v5 = vld [vmem:[#allocation3 + $0x78] sm:$0xff] }
 0x450   : >> { %v1575_v42 = vld [vmem:[#allocation3 + $0x68] sm:$0xff] }
 0x451   : >> { %v1607_v45 = vpack.c.bf16 %v1551_v34, %v1550_v29 }
 0x453   : >> { %2240 = vmatmul.mubr.msk.bf16.gmra.mrb[72].mxu0 %vm641_vm1, %v1607_v45 }
 0x454   : >> { %v1509_v30 = vpop.f32.mrb[72].mxu1 }
 0x455   : >> { %v1511_v19 = vpop.f32.mrb[73].mxu1  ;;  %v1552_v48 = vmul.f32 %v2441_v10, %v1509_v30  ;;  %v1578_v10 = vld [vmem:[#allocation3 + $0x80] sm:$0xff] }
 0x456   : >> { %v1512_v16 = vpop.f32.mrb[74].mxu1  ;;  %v1580_v19 = vld [vmem:[#allocation3 + $0x90] sm:$0xff] }
 0x457   : >> { %v1553_v28 = vmul.f32 %v2439_v8, %v1512_v16  ;;  %v1514_v31 = vpop.f32.mrb[75].mxu1 }
 0x459   : >> { %v1608_v33 = vpack.c.bf16 %v1553_v28, %v1552_v48  ;;  %v1581_v48 = vld [vmem:[#allocation3 + $0x98] sm:$0xff] }
 0x45b   : >> { %2243 = vmatprep.mubr.msk.bf16.mxu0 %vm641_vm1, %v1608_v33  ;;  %v1579_v33 = vld [vmem:[#allocation3 + $0x88] sm:$0xff] }
 0x45c   : >> { %v1517_v1 = vpop.f32.mrb[76].mxu1 }
 0x45d   : >> { %v1519_v6 = vpop.f32.mrb[77].mxu1  ;;  %v1554_v58 = vmul.f32 %v2445_v62, %v1517_v1 }
 0x45e   : >> { %v1520_v52 = vpop.f32.mrb[78].mxu1 }
 0x45f   : >> { %v1555_v3 = vmul.f32 %v2443_v21, %v1520_v52  ;;  %v1522_v7 = vpop.f32.mrb[79].mxu1 }
 0x461   : >> { %v1609_v47 = vpack.c.bf16 %v1555_v3, %v1554_v58  ;;  %v1584_v58 = vld [vmem:[#allocation3 + $0xb0] sm:$0xff]  ;;  %v1582_v3 = vld [vmem:[#allocation3 + $0xa0] sm:$0xff] }
 0x463   : >> { %2244 = vmatmul.mubr.msk.bf16.gmra.mrb[76].mxu0 %vm641_vm1, %v1609_v47  ;;  %v1585_v47 = vld [vmem:[#allocation3 + $0xb8] sm:$0xff] }
 0x4c6   : >> { %v2217_v40 = vpop.f32.mrb[48].mxu0 }
 0x4c7   : >> { %v1827_v57 = vadd.f32 %v2217_v40, %v1564_v35  ;;  %v1698_v51 = vpop.f32.mrb[49].mxu0  ;;  %v1583_v40 = vld [vmem:[#allocation3 + $0xa8] sm:$0xff] }
 0x4c8   : >> { %v1825_v55 = vadd.f32 %v1698_v51, %v1562_v49  ;;  %v2218_v26 = vpop.f32.mrb[50].mxu0 }
 0x4c9   : >> { %1859 = vst.msk [vmem:[#allocation3 + $0x10] sm:$0xff] %vm293_vm0, %v1827_v57  ;;  %v1828_v23 = vadd.f32 %v2218_v26, %v1565_v46  ;;  %v1701_v32 = vpop.f32.mrb[51].mxu0  ;;  %v1588_v26 = vld [vmem:[#allocation3 + $0xd0] sm:$0xff] }
 0x4ca   : >> { %1857 = vst.msk [vmem:[#allocation3] sm:$0xff] %vm293_vm0, %v1825_v55  ;;  %v1826_v22 = vadd.f32 %v1701_v32, %v1563_v0 }
 0x4cb   : >> { %1860 = vst.msk [vmem:[#allocation3 + $0x18] sm:$0xff] %vm293_vm0, %v1828_v23  ;;  %v1586_v23 = vld [vmem:[#allocation3 + $0xc0] sm:$0xff] }
 0x4cc   : >> { %1858 = vst.msk [vmem:[#allocation3 + $0x8] sm:$0xff] %vm293_vm0, %v1826_v22  ;;  %v1589_v22 = vld [vmem:[#allocation3 + $0xd8] sm:$0xff] }
 0x4d6   : >> { %v2221_v37 = vpop.f32.mrb[52].mxu0 }
 0x4d7   : >> { %v1831_v39 = vadd.f32 %v2221_v37, %v1568_v24  ;;  %v1714_v9 = vpop.f32.mrb[53].mxu0  ;;  %v1587_v37 = vld [vmem:[#allocation3 + $0xc8] sm:$0xff] }
 0x4d8   : >> { %v1829_v25 = vadd.f32 %v1714_v9, %v1566_v36  ;;  %v2222_v27 = vpop.f32.mrb[54].mxu0 }
 0x4d9   : >> { %1863 = vst.msk [vmem:[#allocation3 + $0x30] sm:$0xff] %vm293_vm0, %v1831_v39  ;;  %v1832_v11 = vadd.f32 %v2222_v27, %v1569_v14  ;;  %v1717_v12 = vpop.f32.mrb[55].mxu0  ;;  %v1592_v27 = vld [vmem:[#allocation3 + $0xf0] sm:$0xff] }
 0x4da   : >> { %1861 = vst.msk [vmem:[#allocation3 + $0x20] sm:$0xff] %vm293_vm0, %v1829_v25  ;;  %v1830_v38 = vadd.f32 %v1717_v12, %v1567_v44 }
 0x4db   : >> { %1864 = vst.msk [vmem:[#allocation3 + $0x38] sm:$0xff] %vm293_vm0, %v1832_v11  ;;  %v1590_v11 = vld [vmem:[#allocation3 + $0xe0] sm:$0xff] }
 0x4dc   : >> { %1862 = vst.msk [vmem:[#allocation3 + $0x28] sm:$0xff] %vm293_vm0, %v1830_v38  ;;  %v1593_v38 = vld [vmem:[#allocation3 + $0xf8] sm:$0xff] }
 0x4e6   : >> { %v2225_v59 = vpop.f32.mrb[56].mxu0 }
 0x4e7   : >> { %v1835_v61 = vadd.f32 %v2225_v59, %v1572_v13  ;;  %v1730_v63 = vpop.f32.mrb[57].mxu0  ;;  %v1591_v59 = vld [vmem:[#allocation3 + $0xe8] sm:$0xff] }
 0x4e8   : >> { %v1833_v53 = vadd.f32 %v1730_v63, %v1570_v20  ;;  %v2226_v56 = vpop.f32.mrb[58].mxu0 }
 0x4e9   : >> { %1867 = vst.msk [vmem:[#allocation3 + $0x50] sm:$0xff] %vm293_vm0, %v1835_v61  ;;  %v1836_v50 = vadd.f32 %v2226_v56, %v1573_v15  ;;  %v1733_v60 = vpop.f32.mrb[59].mxu0  ;;  %v3195_v56 = vmov (%p581_p11), 0  }
 0x4ea   : >> { %1865 = vst.msk [vmem:[#allocation3 + $0x40] sm:$0xff] %vm293_vm0, %v1833_v53  ;;  %v1834_v17 = vadd.f32 %v1733_v60, %v1571_v4  ;;  %2446 = vset.pattern.permute.xlu1 (%p581_p11), %v3195_v56  ;;  %v1889_v60 = vld [vmem:[#allocation3] sm:$0xff] (%p581_p11) }
 0x4eb   : >> { %1868 = vst.msk [vmem:[#allocation3 + $0x58] sm:$0xff] %vm293_vm0, %v1836_v50  ;;  %v1985_v50 = vld [vmem:[%s3140_s3] sm:$0xff] (%p581_p11)  ;;  %1921 = vxpose.xlu0.b32.start [1/16] (narrow) (%p581_p11), %v1889_v60, 32 }
 0x4ec   : >> { %1866 = vst.msk [vmem:[#allocation3 + $0x48] sm:$0xff] %vm293_vm0, %v1834_v17  ;;  %1991 = vperm.xlu1 (%p581_p11), %2446, %v1985_v50   ;;  %v1986_v17 = vld [vmem:[%s3140_s3 + $0x8] sm:$0xff] (%p581_p11) }
 0x4f0   : > { %1996 = vperm.xlu1 (%p581_p11), %2446, %v1986_v17  }
 0x4f6   : >> { %v2229_v41 = vpop.f32.mrb[60].mxu0 }
 0x4f7   : >> { %v1839_v29 = vadd.f32 %v2229_v41, %v1576_v18  ;;  %v1746_v34 = vpop.f32.mrb[61].mxu0  ;;  %v1890_v18 = vld [vmem:[#allocation3 + $0x8] sm:$0xff] (%p581_p11)  ;;  %v1891_v41 = vld [vmem:[#allocation3 + $0x10] sm:$0xff] (%p581_p11) }
 0x4f8   : >> { %v1837_v54 = vadd.f32 %v1746_v34, %v1574_v2  ;;  %v2230_v43 = vpop.f32.mrb[62].mxu0  ;;  %1922 = vxpose.xlu0.b32.cont [2/16] (narrow) (%p581_p11), %v1890_v18, 32  ;;  %v1987_v2 = vld [vmem:[%s3140_s3 + $0x10] sm:$0xff] (%p581_p11)  ;;  %v1893_v34 = vld [vmem:[#allocation3 + $0x20] sm:$0xff] (%p581_p11) }
 0x4f9   : >> { %1871 = vst.msk [vmem:[#allocation3 + $0x70] sm:$0xff] %vm293_vm0, %v1839_v29  ;;  %v1840_v45 = vadd.f32 %v2230_v43, %v1577_v5  ;;  %v1749_v30 = vpop.f32.mrb[63].mxu0  ;;  %2001 = vperm.xlu1 (%p581_p11), %2446, %v1987_v2   ;;  %v1988_v5 = vld [vmem:[%s3140_s3 + $0x18] sm:$0xff] (%p581_p11) }
 0x4fa   : >> { %1869 = vst.msk [vmem:[#allocation3 + $0x60] sm:$0xff] %vm293_vm0, %v1837_v54  ;;  %v1838_v8 = vadd.f32 %v1749_v30, %v1575_v42  ;;  %v1892_v29 = vld [vmem:[#allocation3 + $0x18] sm:$0xff] (%p581_p11)  ;;  %v1894_v42 = vld [vmem:[#allocation3 + $0x28] sm:$0xff] (%p581_p11)  ;;  %v1895_v54 = vld [vmem:[#allocation3 + $0x30] sm:$0xff] (%p581_p11) }
 0x4fb   : >> { %1872 = vst.msk [vmem:[#allocation3 + $0x78] sm:$0xff] %vm293_vm0, %v1840_v45  ;;  %v1896_v43 = vld [vmem:[#allocation3 + $0x38] sm:$0xff] (%p581_p11)  ;;  %v1897_v45 = vld [vmem:[#allocation3 + $0x40] sm:$0xff] (%p581_p11)  ;;  %v1898_v30 = vld [vmem:[#allocation3 + $0x48] sm:$0xff] (%p581_p11) }
 0x4fc   : >> { %1870 = vst.msk [vmem:[#allocation3 + $0x68] sm:$0xff] %vm293_vm0, %v1838_v8  ;;  %1923 = vxpose.xlu0.b32.cont [3/16] (narrow) (%p581_p11), %v1891_v41, 32  ;;  %v1899_v8 = vld [vmem:[#allocation3 + $0x50] sm:$0xff] (%p581_p11) }
 0x4fd   : > { %2006 = vperm.xlu1 (%p581_p11), %2446, %v1988_v5  }
 0x500   : > { %1924 = vxpose.xlu0.b32.cont [4/16] (narrow) (%p581_p11), %v1892_v29, 32 }
 0x504   : > { %1925 = vxpose.xlu0.b32.cont [5/16] (narrow) (%p581_p11), %v1893_v34, 32 }
 0x506   : >> { %v2233_v16 = vpop.f32.mrb[64].mxu0 }
 0x507   : >> { %v1843_v28 = vadd.f32 %v2233_v16, %v1580_v19  ;;  %v1762_v31 = vpop.f32.mrb[65].mxu0  ;;  %v1900_v19 = vld [vmem:[#allocation3 + $0x58] sm:$0xff] (%p581_p11)  ;;  %v1902_v16 = vld [vmem:[#allocation3 + $0x68] sm:$0xff] (%p581_p11) }
 0x508   : >> { %v1841_v1 = vadd.f32 %v1762_v31, %v1578_v10  ;;  %v2234_v21 = vpop.f32.mrb[66].mxu0  ;;  %1926 = vxpose.xlu0.b32.cont [6/16] (narrow) (%p581_p11), %v1894_v42, 32  ;;  %v1901_v10 = vld [vmem:[#allocation3 + $0x60] sm:$0xff] (%p581_p11) }
 0x509   : >> { %1875 = vst.msk [vmem:[#allocation3 + $0x90] sm:$0xff] %vm293_vm0, %v1843_v28  ;;  %v1844_v6 = vadd.f32 %v2234_v21, %v1581_v48  ;;  %v1765_v62 = vpop.f32.mrb[67].mxu0  ;;  %v1903_v28 = vld [vmem:[#allocation3 + $0x70] sm:$0xff] (%p581_p11) }
 0x50a   : >> { %1873 = vst.msk [vmem:[#allocation3 + $0x80] sm:$0xff] %vm293_vm0, %v1841_v1  ;;  %v1842_v52 = vadd.f32 %v1765_v62, %v1579_v33  ;;  %v1904_v33 = vld [vmem:[#allocation3 + $0x78] sm:$0xff] (%p581_p11) }
 0x50b   : >> { %1876 = vst.msk [vmem:[#allocation3 + $0x98] sm:$0xff] %vm293_vm0, %v1844_v6 }
 0x50c   : >> { %1874 = vst.msk [vmem:[#allocation3 + $0x88] sm:$0xff] %vm293_vm0, %v1842_v52  ;;  %1927 = vxpose.xlu0.b32.cont [7/16] (narrow) (%p581_p11), %v1895_v54, 32 }
 0x510   : > { %1928 = vxpose.xlu0.b32.cont [8/16] (narrow) (%p581_p11), %v1896_v43, 32  ;;  %v1907_v1 = vld [vmem:[#allocation3 + $0x90] sm:$0xff] (%p581_p11) }
 0x511   : > { %v1905_v48 = vld [vmem:[#allocation3 + $0x80] sm:$0xff] (%p581_p11) }
 0x512   : > { %v1908_v21 = vld [vmem:[#allocation3 + $0x98] sm:$0xff] (%p581_p11) }
 0x513   : > { %v1906_v31 = vld [vmem:[#allocation3 + $0x88] sm:$0xff] (%p581_p11) }
 0x514   : > { %1929 = vxpose.xlu0.b32.cont [9/16] (narrow) (%p581_p11), %v1897_v45, 32 }
 0x516   : >> { %v2237_v7 = vpop.f32.mrb[68].mxu0 }
 0x517   : >> { %v1847_v35 = vadd.f32 %v2237_v7, %v1584_v58  ;;  %v1778_v49 = vpop.f32.mrb[69].mxu0 }
 0x518   : >> { %v1845_v46 = vadd.f32 %v1778_v49, %v1582_v3  ;;  %v2238_v57 = vpop.f32.mrb[70].mxu0  ;;  %1930 = vxpose.xlu0.b32.cont [10/16] (narrow) (%p581_p11), %v1898_v30, 32 }
 0x519   : >> { %1879 = vst.msk [vmem:[#allocation3 + $0xb0] sm:$0xff] %vm293_vm0, %v1847_v35  ;;  %v1848_v51 = vadd.f32 %v2238_v57, %v1585_v47  ;;  %v1781_v0 = vpop.f32.mrb[71].mxu0 }
 0x51a   : >> { %1877 = vst.msk [vmem:[#allocation3 + $0xa0] sm:$0xff] %vm293_vm0, %v1845_v46  ;;  %v1846_v55 = vadd.f32 %v1781_v0, %v1583_v40 }
 0x51b   : >> { %1880 = vst.msk [vmem:[#allocation3 + $0xb8] sm:$0xff] %vm293_vm0, %v1848_v51 }
 0x51c   : >> { %1878 = vst.msk [vmem:[#allocation3 + $0xa8] sm:$0xff] %vm293_vm0, %v1846_v55  ;;  %1931 = vxpose.xlu0.b32.cont [11/16] (narrow) (%p581_p11), %v1899_v8, 32 }
 0x520   : > { %1932 = vxpose.xlu0.b32.cont [12/16] (narrow) (%p581_p11), %v1900_v19, 32  ;;  %v1911_v52 = vld [vmem:[#allocation3 + $0xb0] sm:$0xff] (%p581_p11) }
 0x521   : > { %v1909_v6 = vld [vmem:[#allocation3 + $0xa0] sm:$0xff] (%p581_p11) }
 0x522   : > { %v1912_v58 = vld [vmem:[#allocation3 + $0xb8] sm:$0xff] (%p581_p11) }
 0x523   : > { %v1910_v62 = vld [vmem:[#allocation3 + $0xa8] sm:$0xff] (%p581_p11) }
 0x524   : > { %1933 = vxpose.xlu0.b32.cont [13/16] (narrow) (%p581_p11), %v1901_v10, 32 }
 0x526   : >> { %v2241_v32 = vpop.f32.mrb[72].mxu0  ;;  %1953 = vxpose.xlu1.b32.start [1/16] (narrow) (%p581_p11), %v1905_v48, 32 }
 0x527   : >> { %v1851_v24 = vadd.f32 %v2241_v32, %v1588_v26  ;;  %v1794_v36 = vpop.f32.mrb[73].mxu0 }
 0x528   : >> { %v1849_v14 = vadd.f32 %v1794_v36, %v1586_v23  ;;  %v2242_v39 = vpop.f32.mrb[74].mxu0  ;;  %1934 = vxpose.xlu0.b32.cont [14/16] (narrow) (%p581_p11), %v1902_v16, 32 }
 0x529   : >> { %1883 = vst.msk [vmem:[#allocation3 + $0xd0] sm:$0xff] %vm293_vm0, %v1851_v24  ;;  %v1852_v9 = vadd.f32 %v2242_v39, %v1589_v22  ;;  %v1797_v44 = vpop.f32.mrb[75].mxu0 }
 0x52a   : >> { %1881 = vst.msk [vmem:[#allocation3 + $0xc0] sm:$0xff] %vm293_vm0, %v1849_v14  ;;  %v1850_v25 = vadd.f32 %v1797_v44, %v1587_v37  ;;  %1954 = vxpose.xlu1.b32.cont [2/16] (narrow) (%p581_p11), %v1906_v31, 32 }
 0x52b   : >> { %1884 = vst.msk [vmem:[#allocation3 + $0xd8] sm:$0xff] %vm293_vm0, %v1852_v9 }
 0x52c   : >> { %1882 = vst.msk [vmem:[#allocation3 + $0xc8] sm:$0xff] %vm293_vm0, %v1850_v25  ;;  %1935 = vxpose.xlu0.b32.cont [15/16] (narrow) (%p581_p11), %v1903_v28, 32 }
 0x52e   : > { %1955 = vxpose.xlu1.b32.cont [3/16] (narrow) (%p581_p11), %v1907_v1, 32 }
 0x530   : > { %1936 = vxpose.xlu0.b32.end [16/16] (narrow) (%p581_p11), %v1904_v33, 32  ;;  %v1915_v47 = vld [vmem:[#allocation3 + $0xd0] sm:$0xff] (%p581_p11) }
 0x531   : > { %v1913_v3 = vld [vmem:[#allocation3 + $0xc0] sm:$0xff] (%p581_p11) }
 0x532   : > { %1956 = vxpose.xlu1.b32.cont [4/16] (narrow) (%p581_p11), %v1908_v21, 32  ;;  %v1916_v35 = vld [vmem:[#allocation3 + $0xd8] sm:$0xff] (%p581_p11) }
 0x533   : > { %v1914_v7 = vld [vmem:[#allocation3 + $0xc8] sm:$0xff] (%p581_p11) }
 0x536   : >> { %v2245_v12 = vpop.f32.mrb[76].mxu0  ;;  %583 = sbr.rel (!%p581_p11) target bundleno = 294 (0x126), region = 82  ;;  %1957 = vxpose.xlu1.b32.cont [5/16] (narrow) (%p581_p11), %v1909_v6, 32 }
 0x537   : >> { %v1855_v13 = vadd.f32 %v2245_v12, %v1592_v27  ;;  %v1810_v20 = vpop.f32.mrb[77].mxu0 }
 0x538   : >> { %v1853_v15 = vadd.f32 %v1810_v20, %v1590_v11  ;;  %v2246_v61 = vpop.f32.mrb[78].mxu0 }
 0x539   : >> { %1887 = vst.msk [vmem:[#allocation3 + $0xf0] sm:$0xff] %vm293_vm0, %v1855_v13  ;;  %v1856_v63 = vadd.f32 %v2246_v61, %v1593_v38  ;;  %v1813_v4 = vpop.f32.mrb[79].mxu0 }
 0x53a   : >> { %1885 = vst.msk [vmem:[#allocation3 + $0xe0] sm:$0xff] %vm293_vm0, %v1853_v15  ;;  %v1854_v53 = vadd.f32 %v1813_v4, %v1591_v59  ;;  %1958 = vxpose.xlu1.b32.cont [6/16] (narrow) (%p581_p11), %v1910_v62, 32 }
 0x53b   : >> { %1888 = vst.msk [vmem:[#allocation3 + $0xf8] sm:$0xff] %vm293_vm0, %v1856_v63 }
 0x53c   : >> { %1886 = vst.msk [vmem:[#allocation3 + $0xe8] sm:$0xff] %vm293_vm0, %v1854_v53 }
 0x53e   : > { %1959 = vxpose.xlu1.b32.cont [7/16] (narrow) %v1911_v52, 32 }
 0x540   : > { %v1919_v46 = vld [vmem:[#allocation3 + $0xf0] sm:$0xff] }
 0x541   : > { %v1917_v49 = vld [vmem:[#allocation3 + $0xe0] sm:$0xff] }
 0x542   : > { %1960 = vxpose.xlu1.b32.cont [8/16] (narrow) %v1912_v58, 32  ;;  %v1920_v57 = vld [vmem:[#allocation3 + $0xf8] sm:$0xff] }
 0x543   : > { %v1918_v40 = vld [vmem:[#allocation3 + $0xe8] sm:$0xff] }
 0x546   : > { %1961 = vxpose.xlu1.b32.cont [9/16] (narrow) %v1913_v3, 32 }
 0x54a   : > { %1962 = vxpose.xlu1.b32.cont [10/16] (narrow) %v1914_v7, 32 }
 0x54e   : > { %1963 = vxpose.xlu1.b32.cont [11/16] (narrow) %v1915_v47, 32 }
 0x552   : > { %1964 = vxpose.xlu1.b32.cont [12/16] (narrow) %v1916_v35, 32 }
 0x556   : > { %1965 = vxpose.xlu1.b32.cont [13/16] (narrow) %v1917_v49, 32 }
 0x559   : > { %2447 = vset.pattern.permute.xlu0 %v3195_v56 }
 0x55a   : > { %1966 = vxpose.xlu1.b32.cont [14/16] (narrow) %v1918_v40, 32 }
 0x55e   : > { %1967 = vxpose.xlu1.b32.cont [15/16] (narrow) %v1919_v46, 32 }
 0x562   : > { %1968 = vxpose.xlu1.b32.end [16/16] (narrow) %v1920_v57, 32 }
 0x56b   : > { %v1992_v51 = vpop.permute.xlu1 %1991 }
 0x56f   : > { %v1997_v26 = vpop.permute.xlu1 %1996 }
 0x574   : > { %v1937_v0 = vpop.trf.xlu0 }
 0x575   : > { %v2009_v55 = vadd.f32 %v1992_v51, %v1937_v0 }
 0x577   : > { %2017 = vst [vmem:[%s2704_s23] sm:$0xff] %v2009_v55 }
 0x578   : > { %v1938_v23 = vpop.trf.xlu0  ;;  %v2002_v22 = vpop.permute.xlu1 %2001 }
 0x579   : > { %v2011_v32 = vadd.f32 %v1997_v26, %v1938_v23 }
 0x57b   : > { %2019 = vst [vmem:[%s2704_s23 + $0x10] sm:$0xff] %v2011_v32 }
 0x57c   : > { %v1939_v24 = vpop.trf.xlu0  ;;  %v2007_v37 = vpop.permute.xlu1 %2006 }
 0x57d   : > { %v2013_v36 = vadd.f32 %v2002_v22, %v1939_v24 }
 0x57f   : > { %2021 = vst [vmem:[%s2704_s23 + $0x20] sm:$0xff] %v2013_v36 }
 0x580   : > { %v1940_v14 = vpop.trf.xlu0 }
 0x581   : > { %v2015_v39 = vadd.f32 %v2007_v37, %v1940_v14 }
 0x583   : > { %2023 = vst [vmem:[%s2704_s23 + $0x30] sm:$0xff] %v2015_v39 }
 0x5a6   : > { %v1969_v9 = vpop.trf.xlu1 }
 0x5a7   : > { %v2010_v44 = vadd.f32 %v1992_v51, %v1969_v9 }
 0x5a9   : > { %2018 = vst [vmem:[%s2704_s23 + $0x8] sm:$0xff] %v2010_v44 }
 0x5aa   : > { %v1970_v25 = vpop.trf.xlu1 }
 0x5ab   : > { %v2012_v27 = vadd.f32 %v1997_v26, %v1970_v25 }
 0x5ad   : > { %2020 = vst [vmem:[%s2704_s23 + $0x18] sm:$0xff] %v2012_v27 }
 0x5ae   : > { %v1971_v11 = vpop.trf.xlu1 }
 0x5af   : > { %v2014_v12 = vadd.f32 %v2002_v22, %v1971_v11 }
 0x5b1   : > { %2022 = vst [vmem:[%s2704_s23 + $0x28] sm:$0xff] %v2014_v12 }
 0x5b2   : > { %v1972_v38 = vpop.trf.xlu1 }
 0x5b3   : > { %v2016_v13 = vadd.f32 %v2007_v37, %v1972_v38 }
 0x5b5   : > { %2024 = vst [vmem:[%s2704_s23 + $0x38] sm:$0xff] %v2016_v13 }
 0x5b6   : > { %2461 = shalt.err (!%p2458_p4)
}
 0x5b7   : > { %s2462_s27 = scalar_lea.hbm %s3089_s20, 1024  ;;  %s2466_s7 = scalar_lea.hbm %s3141_s4, 2048 }
 0x5b8   : > { %p2463_p7 = scmp.ne.s32.totalorder %s3089_s20, %s2462_s27  ;;  %p2467_p10 = scmp.lt.u32.totalorder %s3089_s20, %s3141_s4 }
 0x5b9   : > { %p2468_p11 = scmp.lt.u32.totalorder %s2466_s7, %s2462_s27  ;;  %p2470_p13 = scmp.lt.u32.totalorder %s2462_s27, %s3089_s20 }
 0x5ba   : > { %p2464_p8 = pnand %p2463_p7, %p2589_p5 }
 0x5bb   : > { %p2469_p12 = por %p2468_p11, %p2467_p10 }
 0x5bc   : > { %p2465_p9 = pneg %p2464_p8 }
 0x5bd   : > { %p2471_p0 = por %p2470_p13, %p2469_p12 }
 0x5bf   : > { %p2472_p1 = pnand %p2471_p0, %p2465_p9 }
 0x5c1   : > { %2475 = shalt.err (!%p2472_p1)
}
 0x5c2   : > { %s2524_s29 = smov 256   ;;  %s2525_s10 = smov 16  }
 0x5c3   : > { %2253 = dma.vmem_to_hbm [thread:$0]  (%p2589_p5), %s3091_s12, 1024, %s3089_s20, %s3096_s22, %s2524_s29, %s2524_s29, %s2525_s10  }
 0x5c4 PF: > { %p2259_p2 = scmp.ge.s32.totalorder %s2514_s18, 2  ;;  %s2054_s11 = sand.u32 1, %s2502_s15  }
 0x5c5   : > { %s2055_s13 = scalar_lea.sflag [#allocation5], %s2054_s11 }
 0x5c6   : > { %p2256_p3 = pnand %p2259_p2, %p2593_p6 }
 0x5c8   : > { %2497 = dma.done.wait (!%p2256_p3), %s2055_s13, 1024  }
 0x5c9   : > { %2499 = vsyncadd (!%p2256_p3), %s2055_s13, 4294966272  ;;  %p14_p4 = scmp.ge.s32.totalorder %s2576_s21, 4   ;;  %s3196_s15 = smov %s2506_s16 }
 0x5ca   : > { %s3197_s16 = smov %s2510_s17  ;;  %s3198_s17 = smov %s2587_s24 }
 0x5cb   : > { %s3199_s18 = smov %s2576_s21  ;;  %16 = sbr.rel (!%p14_p4) target bundleno = 3 (0x3), region = 93 }
 0x5d2   :  { %2060 = vsyncpa [#allocation5], 1 }
 0x5d3   :  { %2062 = vsyncpa [#allocation5 + $0x1], 1 }

</bundles_post_ra>
